<compile_context>
chip_gen: v7x
topology: tpu7x:2x2x1
jax: 0.10.0
libtpu: 0.0.40
codegen_flags: <defaults>
</compile_context>

<pallas_src>
import jax
import jax.numpy as jnp
from jax.experimental import pallas as pl
from jax.experimental.pallas import tpu as pltpu


def _round_up(n, m):
    return ((n + m - 1) // m) * m


def vae_encoder_kernel(x_ref, w1_ref, b1_ref, w2_ref, b2_ref,
                       wh_ref, bh_ref, out_ref):
    # Cast to bf16 in-kernel (VPU cast is free; avoids a wrapper-side XLA pass).
    x = x_ref[...].astype(jnp.bfloat16)
    # fc1: bf16 MXU matmul, f32 accumulate; bias + relu on the f32 accumulator.
    h = jnp.dot(x, w1_ref[...], preferred_element_type=jnp.float32)
    h = jnp.maximum(h + b1_ref[...], 0.0)
    # fc2
    h = jnp.dot(h.astype(jnp.bfloat16), w2_ref[...],
                preferred_element_type=jnp.float32)
    h = jnp.maximum(h + b2_ref[...], 0.0)
    # Fused mu/logvar head: one (512, 2*latent) matmul, one lane-dense store.
    head = jnp.dot(h.astype(jnp.bfloat16), wh_ref[...],
                   preferred_element_type=jnp.float32) + bh_ref[...]
    out_ref[...] = head.astype(out_ref.dtype)


def vae_encoder(x, params, *, block_b=256):
    """x: (B, input_dim) float32. params: dict of (in, out) weights / (1, out) biases.

    Returns (mu, logvar), each (B, latent_dim) float32.
    """
    B, input_dim = x.shape
    h1 = params["w1"].shape[1]
    h2 = params["w2"].shape[1]
    latent_dim = params["wmu"].shape[1]

    # Fuse the two heads: one (512, 2*latent_dim) matmul instead of two.
    w_head = jnp.concatenate([params["wmu"], params["wlv"]], axis=1).astype(jnp.bfloat16)
    b_head = jnp.concatenate([params["bmu"], params["blv"]], axis=1).astype(jnp.float32)

    # bf16 weights for the MXU; biases stay f32 (f32 VPU epilogue).
    w1 = params["w1"].astype(jnp.bfloat16)
    w2 = params["w2"].astype(jnp.bfloat16)
    b1 = params["b1"].astype(jnp.float32)
    b2 = params["b2"].astype(jnp.float32)

    # Batch tiling. Clamp to the (8-rounded) batch; for batches big enough to
    # split, cap at ceil(B/2) so the grid has >= 2 "parallel" steps and the
    # batch shards across both TensorCores on v7x (harmless on 1-TC chips).
    block_b = max(8, min(block_b, _round_up(B, 8)))
    if B > 128:
        block_b = min(block_b, _round_up(pl.cdiv(B, 2), 8))
    grid = (pl.cdiv(B, block_b),)
    # No wrapper-side padding: Pallas handles the ragged last block (OOB reads
    # feed only the discarded output rows; OOB writes are dropped). Safe here
    # because the kernel is row-independent and contains no exp/log.

    # Constant-index (weight/bias) blocks never re-fetch: single-buffer them.
    def const_spec(shape):
        return pl.BlockSpec(shape, lambda i: (0, 0), pipeline_mode=pl.Buffered(1))

    grid_spec = pltpu.PrefetchScalarGridSpec(
        num_scalar_prefetch=0,
        grid=grid,
        in_specs=[
            pl.BlockSpec((block_b, input_dim), lambda i: (i, 0)),       # x tile (f32)
            const_spec(w1.shape), const_spec(b1.shape),
            const_spec(w2.shape), const_spec(b2.shape),
            const_spec(w_head.shape), const_spec(b_head.shape),
        ],
        out_specs=pl.BlockSpec((block_b, 2 * latent_dim), lambda i: (i, 0)),
    )

    # Advisory cost estimate so XLA schedules/overlaps the custom call well.
    flops = 2 * B * (input_dim * h1 + h1 * h2 + h2 * 2 * latent_dim)
    bytes_accessed = (
        B * input_dim * 4                                   # x (f32)
        + (w1.size + w2.size + w_head.size) * 2             # bf16 weights
        + (b1.size + b2.size + b_head.size) * 4              # f32 biases
        + B * 2 * latent_dim * 4                              # fused output
    )
    cost = pl.CostEstimate(flops=int(flops), transcendentals=0,
                           bytes_accessed=int(bytes_accessed))

    cp_kwargs = dict(dimension_semantics=("parallel",))
    if block_b >= 1024:
        # v5e's default scoped VMEM is 16 MiB; big tiles need explicit headroom.
        cp_kwargs["vmem_limit_bytes"] = 28 << 20
    compiler_params = pltpu.CompilerParams(**cp_kwargs)

    out = pl.pallas_call(
        vae_encoder_kernel,
        out_shape=jax.ShapeDtypeStruct((B, 2 * latent_dim), jnp.float32),
        grid_spec=grid_spec,
        compiler_params=compiler_params,
        cost_estimate=cost,
    )(x.astype(jnp.float32), w1, b1, w2, b2, w_head, b_head)

    # Split the fused lane-dense slab outside the kernel (free XLA slice).
    return out[:, :latent_dim], out[:, latent_dim:]


def init_params(key, input_dim, latent_dim):
    """Deterministic init mimicking nn.Linear's U(-1/sqrt(fan_in), 1/sqrt(fan_in)).
    Weights stored as (in, out) — transposed vs PyTorch's (out, in)."""
    def linear(k, fan_in, fan_out):
        kw, kb = jax.random.split(k)
        bound = 1.0 / jnp.sqrt(fan_in)
        w = jax.random.uniform(kw, (fan_in, fan_out), jnp.float32, -bound, bound)
        b = jax.random.uniform(kb, (1, fan_out), jnp.float32, -bound, bound)
        return w, b

    k1, k2, k3, k4 = jax.random.split(key, 4)
    w1, b1 = linear(k1, input_dim, 1024)
    w2, b2 = linear(k2, 1024, 512)
    wmu, bmu = linear(k3, 512, latent_dim)
    wlv, blv = linear(k4, 512, latent_dim)
    return dict(w1=w1, b1=b1, w2=w2, b2=b2,
                wmu=wmu, bmu=bmu, wlv=wlv, blv=blv)


def ref_forward(x, params):
    """Pure-JAX reference matching the kernel's bf16-matmul / f32-accumulate precision."""
    bf = jnp.bfloat16
    h = jnp.dot(x.astype(bf), params["w1"].astype(bf),
                preferred_element_type=jnp.float32)
    h = jnp.maximum(h + params["b1"], 0.0)
    h = jnp.dot(h.astype(bf), params["w2"].astype(bf),
                preferred_element_type=jnp.float32)
    h = jnp.maximum(h + params["b2"], 0.0)
    hb = h.astype(bf)
    mu = jnp.dot(hb, params["wmu"].astype(bf),
                 preferred_element_type=jnp.float32) + params["bmu"]
    lv = jnp.dot(hb, params["wlv"].astype(bf),
                 preferred_element_type=jnp.float32) + params["blv"]
    return mu, lv


if __name__ == "__main__":
    INPUT_DIM = 256
    LATENT_DIM = 128

    key = jax.random.PRNGKey(0)
    k_param, k_x1, k_x2 = jax.random.split(key, 3)
    params = init_params(k_param, INPUT_DIM, LATENT_DIM)

    # Small batch: clamped tile, single grid step (weight-HBM-bound regime).
    x_small = jax.random.normal(k_x1, (8, INPUT_DIM), jnp.float32)
    mu_s, lv_s = vae_encoder(x_small, params)
    jax.block_until_ready((mu_s, lv_s))

    # Ragged larger batch: exercises the >=2-step grid (megacore split on v7x)
    # and the masked ragged last block.
    x_big = jax.random.normal(k_x2, (200, INPUT_DIM), jnp.float32)
    mu_b, lv_b = vae_encoder(x_big, params)
    jax.block_until_ready((mu_b, lv_b))

    for x, mu, lv in ((x_small, mu_s, lv_s), (x_big, mu_b, lv_b)):
        mu_ref, lv_ref = ref_forward(x, params)
        assert mu.shape == mu_ref.shape and lv.shape == lv_ref.shape
        assert jnp.allclose(mu, mu_ref, atol=5e-3, rtol=5e-3), \
            float(jnp.max(jnp.abs(mu - mu_ref)))
        assert jnp.allclose(lv, lv_ref, atol=5e-3, rtol=5e-3), \
            float(jnp.max(jnp.abs(lv - lv_ref)))

    print("KERNEL_OK")
</pallas_src>

<mosaic_0001>
module attributes {stable_mosaic.version = 11 : i64} {
  func.func @vae_encoder_kernel(%arg0: i32, %arg1: memref<8x256xf32, #tpu.memory_space<vmem>>, %arg2: memref<256x1024xbf16, #tpu.memory_space<vmem>>, %arg3: memref<1x1024xf32, #tpu.memory_space<vmem>>, %arg4: memref<1024x512xbf16, #tpu.memory_space<vmem>>, %arg5: memref<1x512xf32, #tpu.memory_space<vmem>>, %arg6: memref<512x256xbf16, #tpu.memory_space<vmem>>, %arg7: memref<1x256xf32, #tpu.memory_space<vmem>>, %arg8: memref<8x256xf32, #tpu.memory_space<vmem>>) attributes {dimension_semantics = [#tpu.dimension_semantics<parallel>], iteration_bounds = array<i64: 1>, scalar_prefetch = 0 : i64, scratch_operands = 0 : i64, tpu.core_type = #tpu.core_type<tc>, window_params = [{transform_indices = @transform_0, window_bounds = array<i64: 8, 256>}, {pipeline_mode = #tpu.pipeline_mode<synchronous>, transform_indices = @transform_1, window_bounds = array<i64: 256, 1024>}, {pipeline_mode = #tpu.pipeline_mode<synchronous>, transform_indices = @transform_2, window_bounds = array<i64: 1, 1024>}, {pipeline_mode = #tpu.pipeline_mode<synchronous>, transform_indices = @transform_3, window_bounds = array<i64: 1024, 512>}, {pipeline_mode = #tpu.pipeline_mode<synchronous>, transform_indices = @transform_4, window_bounds = array<i64: 1, 512>}, {pipeline_mode = #tpu.pipeline_mode<synchronous>, transform_indices = @transform_5, window_bounds = array<i64: 512, 256>}, {pipeline_mode = #tpu.pipeline_mode<synchronous>, transform_indices = @transform_6, window_bounds = array<i64: 1, 256>}, {transform_indices = @transform_7, window_bounds = array<i64: 8, 256>}]} {
    %c0 = arith.constant 0 : index
    %c0_0 = arith.constant 0 : index
    %0 = vector.load %arg1[%c0, %c0_0] : memref<8x256xf32, #tpu.memory_space<vmem>>, vector<8x256xf32>
    %1 = arith.truncf %0 : vector<8x256xf32> to vector<8x256xbf16>
    %c0_1 = arith.constant 0 : index
    %c0_2 = arith.constant 0 : index
    %2 = vector.load %arg2[%c0_1, %c0_2] : memref<256x1024xbf16, #tpu.memory_space<vmem>>, vector<256x1024xbf16>
    %cst = arith.constant dense<0.000000e+00> : vector<8x1024xf32>
    %3 = tpu.matmul %1, %2, %cst {dimension_numbers = #tpu.dot_dimension_numbers<[1], [0], [0], [1], [0, 0, 1, 1], [], []>} : vector<8x256xbf16>, vector<256x1024xbf16>, vector<8x1024xf32> -> vector<8x1024xf32>
    %c0_3 = arith.constant 0 : index
    %c0_4 = arith.constant 0 : index
    %4 = vector.load %arg3[%c0_3, %c0_4] : memref<1x1024xf32, #tpu.memory_space<vmem>>, vector<1x1024xf32>
    %5 = vector.broadcast %4 : vector<1x1024xf32> to vector<8x1024xf32>
    %6 = arith.addf %3, %5 : vector<8x1024xf32>
    %cst_5 = arith.constant 0.000000e+00 : f32
    %7 = vector.broadcast %cst_5 : f32 to vector<8x1024xf32>
    %8 = arith.maximumf %6, %7 : vector<8x1024xf32>
    %9 = arith.truncf %8 : vector<8x1024xf32> to vector<8x1024xbf16>
    %c0_6 = arith.constant 0 : index
    %c0_7 = arith.constant 0 : index
    %10 = vector.load %arg4[%c0_6, %c0_7] : memref<1024x512xbf16, #tpu.memory_space<vmem>>, vector<1024x512xbf16>
    %cst_8 = arith.constant dense<0.000000e+00> : vector<8x512xf32>
    %11 = tpu.matmul %9, %10, %cst_8 {dimension_numbers = #tpu.dot_dimension_numbers<[1], [0], [0], [1], [0, 0, 1, 1], [], []>} : vector<8x1024xbf16>, vector<1024x512xbf16>, vector<8x512xf32> -> vector<8x512xf32>
    %c0_9 = arith.constant 0 : index
    %c0_10 = arith.constant 0 : index
    %12 = vector.load %arg5[%c0_9, %c0_10] : memref<1x512xf32, #tpu.memory_space<vmem>>, vector<1x512xf32>
    %13 = vector.broadcast %12 : vector<1x512xf32> to vector<8x512xf32>
    %14 = arith.addf %11, %13 : vector<8x512xf32>
    %cst_11 = arith.constant 0.000000e+00 : f32
    %15 = vector.broadcast %cst_11 : f32 to vector<8x512xf32>
    %16 = arith.maximumf %14, %15 : vector<8x512xf32>
    %17 = arith.truncf %16 : vector<8x512xf32> to vector<8x512xbf16>
    %c0_12 = arith.constant 0 : index
    %c0_13 = arith.constant 0 : index
    %18 = vector.load %arg6[%c0_12, %c0_13] : memref<512x256xbf16, #tpu.memory_space<vmem>>, vector<512x256xbf16>
    %cst_14 = arith.constant dense<0.000000e+00> : vector<8x256xf32>
    %19 = tpu.matmul %17, %18, %cst_14 {dimension_numbers = #tpu.dot_dimension_numbers<[1], [0], [0], [1], [0, 0, 1, 1], [], []>} : vector<8x512xbf16>, vector<512x256xbf16>, vector<8x256xf32> -> vector<8x256xf32>
    %c0_15 = arith.constant 0 : index
    %c0_16 = arith.constant 0 : index
    %20 = vector.load %arg7[%c0_15, %c0_16] : memref<1x256xf32, #tpu.memory_space<vmem>>, vector<1x256xf32>
    %21 = vector.broadcast %20 : vector<1x256xf32> to vector<8x256xf32>
    %22 = arith.addf %19, %21 : vector<8x256xf32>
    %c0_17 = arith.constant 0 : index
    %c0_18 = arith.constant 0 : index
    %23 = vector.load %arg8[%c0_17, %c0_18] : memref<8x256xf32, #tpu.memory_space<vmem>>, vector<8x256xf32>
    tpu.vector_store %arg8[%c0_17, %c0_18], %22 {strides = array<i32>} : memref<8x256xf32, #tpu.memory_space<vmem>>, vector<8x256xf32>,
    return
  }
  func.func @transform_0(%arg0: i32) -> (i32, i32) {
    %c0_i32 = arith.constant 0 : i32
    %c0_i32_0 = arith.constant 0 : i32
    return %arg0, %c0_i32 : i32, i32
  }
  func.func @transform_1(%arg0: i32) -> (i32, i32) {
    %c0_i32 = arith.constant 0 : i32
    %c0_i32_0 = arith.constant 0 : i32
    %c0_i32_1 = arith.constant 0 : i32
    return %c0_i32, %c0_i32_0 : i32, i32
  }
  func.func @transform_2(%arg0: i32) -> (i32, i32) {
    %c0_i32 = arith.constant 0 : i32
    %c0_i32_0 = arith.constant 0 : i32
    %c0_i32_1 = arith.constant 0 : i32
    return %c0_i32, %c0_i32_0 : i32, i32
  }
  func.func @transform_3(%arg0: i32) -> (i32, i32) {
    %c0_i32 = arith.constant 0 : i32
    %c0_i32_0 = arith.constant 0 : i32
    %c0_i32_1 = arith.constant 0 : i32
    return %c0_i32, %c0_i32_0 : i32, i32
  }
  func.func @transform_4(%arg0: i32) -> (i32, i32) {
    %c0_i32 = arith.constant 0 : i32
    %c0_i32_0 = arith.constant 0 : i32
    %c0_i32_1 = arith.constant 0 : i32
    return %c0_i32, %c0_i32_0 : i32, i32
  }
  func.func @transform_5(%arg0: i32) -> (i32, i32) {
    %c0_i32 = arith.constant 0 : i32
    %c0_i32_0 = arith.constant 0 : i32
    %c0_i32_1 = arith.constant 0 : i32
    return %c0_i32, %c0_i32_0 : i32, i32
  }
  func.func @transform_6(%arg0: i32) -> (i32, i32) {
    %c0_i32 = arith.constant 0 : i32
    %c0_i32_0 = arith.constant 0 : i32
    %c0_i32_1 = arith.constant 0 : i32
    return %c0_i32, %c0_i32_0 : i32, i32
  }
  func.func @transform_7(%arg0: i32) -> (i32, i32) {
    %c0_i32 = arith.constant 0 : i32
    %c0_i32_0 = arith.constant 0 : i32
    return %arg0, %c0_i32 : i32, i32
  }
}

</mosaic_0001>

<bundles_post_ra>
// kernel: tpu_custom_call.1
= control target key start
LH: loop header
LB: loop body
LE: loop exit
PB: predicated region body
PF: predicated region fallthrough
CT: control target
= control target key end

     0   :  { %12 = vsyncpa [#allocation3], 0  ;;  %s4788_s0 = inlined_call_operand.hbm [shape: f32[8,256], index: 0, kind: input, shape index: {}]   ;;  %s4789_s1 = inlined_call_operand.hbm [shape: bf16[256,1024], index: 1, kind: input, shape index: {}]   ;;  %s4790_s2 = inlined_call_operand.hbm [shape: f32[1,1024], index: 2, kind: input, shape index: {}]   ;;  %s4791_s3 = inlined_call_operand.hbm [shape: bf16[1024,512], index: 3, kind: input, shape index: {}]   ;;  %s4792_s4 = inlined_call_operand.vmem [shape: f32[1,512], index: 4, kind: input, shape index: {}]   ;;  %s4793_s5 = inlined_call_operand.hbm [shape: bf16[512,256], index: 5, kind: input, shape index: {}]   ;;  %s4794_s6 = inlined_call_operand.vmem [shape: f32[1,256], index: 6, kind: input, shape index: {}]   ;;  %s4795_s7 = inlined_call_operand.hbm [shape: f32[8,256], index: 7, kind: output, shape index: {}]  }
   0x1   :  { %13 = vsyncpa [#allocation6], 0 }
   0x2   :  { %14 = vsyncpa [#allocation9], 0 }
   0x3   :  { %15 = vsyncpa [#allocation4], 0  ;;  %s4590_s24 = smov [#allocation5]   ;;  %s4450_s28 = scalar_lea.hbm %s4789_s1, 16384 }
   0x4   :  { %s31_s25 = sshll.u32 %s4590_s24, 4  ;;  %p4451_p0 = scmp.ne.s32.totalorder %s4789_s1, %s4450_s28  ;;  %s32_s25 = int_to_ptr.vmem [resolvable:$true] %s31_s25 }
   0x5   :  { %p4454_p1 = scmp.lt.u32.totalorder %s4450_s28, %s4789_s1 }
   0x7   :  { %p4456_p2 = pnand %p4454_p1, %p4451_p0 }
   0x9   :  { %4459 = shalt.err (!%p4456_p2)
}
   0xa   :  { %s4460_s10 = scalar_lea.vmem %s32_s25, 16384  ;;  %p4465_p4 = scmp.lt.s32.totalorder %s32_s25, %s32_s25 }
   0xb   :  { %p4461_p3 = scmp.ne.s32.totalorder %s32_s25, %s4460_s10  ;;  %p4466_p5 = scmp.lt.s32.totalorder %s4460_s10, %s4460_s10 }
   0xd   :  { %p4467_p6 = por %p4466_p5, %p4465_p4 }
   0xf   :  { %p4468_p7 = pnand %p4467_p6, %p4461_p3 }
  0x11   :  { %4471 = shalt.err (!%p4468_p7)
}
  0x12   :  { %s4591_s11 = smov 512   ;;  %s4592_s12 = smov 32  }
  0x13   :  { %37 = dma.hbm_to_vmem [thread:$0]  %s4789_s1, 16384, %s32_s25, [#allocation6], %s4591_s11, %s4591_s11, %s4592_s12  }
  0x14   :  { %s4593_s15 = smov [#allocation8]   ;;  %s4472_s19 = scalar_lea.hbm %s4791_s3, 32768 }
  0x15   :  { %s53_s16 = sshll.u32 %s4593_s15, 4  ;;  %p4473_p8 = scmp.ne.s32.totalorder %s4791_s3, %s4472_s19  ;;  %s54_s16 = int_to_ptr.vmem [resolvable:$true] %s53_s16 }
  0x16   :  { %p4476_p9 = scmp.lt.u32.totalorder %s4472_s19, %s4791_s3 }
  0x18   :  { %p4478_p10 = pnand %p4476_p9, %p4473_p8 }
  0x1a   :  { %4481 = shalt.err (!%p4478_p10)
}
  0x1b   :  { %s4482_s24 = scalar_lea.vmem %s54_s16, 32768  ;;  %p4487_p12 = scmp.lt.s32.totalorder %s54_s16, %s54_s16 }
  0x1c   :  { %p4483_p11 = scmp.ne.s32.totalorder %s54_s16, %s4482_s24  ;;  %p4488_p13 = scmp.lt.s32.totalorder %s4482_s24, %s4482_s24 }
  0x1e   :  { %p4489_p0 = por %p4488_p13, %p4487_p12 }
  0x20   :  { %p4490_p1 = pnand %p4489_p0, %p4483_p11 }
  0x22   :  { %4493 = shalt.err (!%p4490_p1)
}
  0x23   :  { %s4594_s1 = smov 256   ;;  %s4595_s25 = smov 16  }
  0x24   :  { %59 = dma.hbm_to_vmem [thread:$0]  %s4791_s3, 32768, %s54_s16, [#allocation9], %s4594_s1, %s4594_s1, %s4595_s25  }
  0x25   :  { %s4596_s28 = smov [#allocation2]   ;;  %s4597_s30 = smov [#allocation7]  }
  0x26   :  { %s22_s29 = sshll.u32 %s4596_s28, 4  ;;  %s44_s8 = sshll.u32 %s4597_s30, 4  ;;  %s23_s29 = int_to_ptr.vmem [resolvable:$true] %s22_s29  ;;  %s45_s8 = int_to_ptr.vmem [resolvable:$true] %s44_s8 }
  0x27   :  { %s4494_s11 = scalar_lea.hbm %s4788_s0, 256 }
  0x28   :  { %p4495_p2 = scmp.ne.s32.totalorder %s4788_s0, %s4494_s11  ;;  %p4498_p3 = scmp.lt.u32.totalorder %s4494_s11, %s4788_s0 }
  0x2a   :  { %p4500_p4 = pnand %p4498_p3, %p4495_p2 }
  0x2c   :  { %4503 = shalt.err (!%p4500_p4)
}
  0x2d   :  { %s4504_s3 = scalar_lea.vmem %s23_s29, 256  ;;  %p4509_p6 = scmp.lt.s32.totalorder %s23_s29, %s23_s29 }
  0x2e   :  { %p4505_p5 = scmp.ne.s32.totalorder %s23_s29, %s4504_s3  ;;  %p4510_p7 = scmp.lt.s32.totalorder %s4504_s3, %s4504_s3 }
  0x30   :  { %p4511_p8 = por %p4510_p7, %p4509_p6 }
  0x32   :  { %p4512_p9 = pnand %p4511_p8, %p4505_p5 }
  0x34   :  { %4515 = shalt.err (!%p4512_p9)
}
  0x35   :  { %25 = dma.hbm_to_vmem [thread:$0]  %s4788_s0, 256, %s23_s29, [#allocation3]  }
  0x36   :  { %s4516_s20 = scalar_lea.hbm %s4790_s2, 128 }
  0x37   :  { %p4517_p10 = scmp.ne.s32.totalorder %s4790_s2, %s4516_s20  ;;  %p4520_p11 = scmp.lt.u32.totalorder %s4516_s20, %s4790_s2 }
  0x39   :  { %p4522_p12 = pnand %p4520_p11, %p4517_p10 }
  0x3b   :  { %4525 = shalt.err (!%p4522_p12)
}
  0x3c   :  { %s4526_s1 = scalar_lea.vmem %s45_s8, 128  ;;  %p4531_p0 = scmp.lt.s32.totalorder %s45_s8, %s45_s8 }
  0x3d   :  { %p4527_p13 = scmp.ne.s32.totalorder %s45_s8, %s4526_s1  ;;  %p4532_p1 = scmp.lt.s32.totalorder %s4526_s1, %s4526_s1 }
  0x3f   :  { %p4533_p2 = por %p4532_p1, %p4531_p0 }
  0x41   :  { %p4534_p3 = pnand %p4533_p2, %p4527_p13 }
  0x43   :  { %4537 = shalt.err (!%p4534_p3)
}
  0x44   :  { %47 = dma.hbm_to_vmem [thread:$0]  %s4790_s2, 128, %s45_s8, [#allocation6]  }
  0x45   :  { %s4598_s26 = smov [#allocation10]   ;;  %s4538_s30 = scalar_lea.hbm %s4793_s5, 8192 }
  0x46   :  { %s67_s27 = sshll.u32 %s4598_s26, 4  ;;  %p4539_p4 = scmp.ne.s32.totalorder %s4793_s5, %s4538_s30  ;;  %s68_s27 = int_to_ptr.vmem [resolvable:$true] %s67_s27 }
  0x47   :  { %p4542_p5 = scmp.lt.u32.totalorder %s4538_s30, %s4793_s5 }
  0x49   :  { %p4544_p6 = pnand %p4542_p5, %p4539_p4 }
  0x4b   :  { %4547 = shalt.err (!%p4544_p6)
}
  0x4c   :  { %s4548_s13 = scalar_lea.vmem %s68_s27, 8192  ;;  %p4553_p8 = scmp.lt.s32.totalorder %s68_s27, %s68_s27 }
  0x4d   :  { %p4549_p7 = scmp.ne.s32.totalorder %s68_s27, %s4548_s13  ;;  %p4554_p9 = scmp.lt.s32.totalorder %s4548_s13, %s4548_s13 }
  0x4f   :  { %p4555_p10 = por %p4554_p9, %p4553_p8 }
  0x51   :  { %p4556_p11 = pnand %p4555_p10, %p4549_p7 }
  0x53   :  { %4559 = shalt.err (!%p4556_p11)
}
  0x54   :  { %s4599_s2 = smov 128   ;;  %s4600_s8 = smov 8  }
  0x55   :  { %73 = dma.hbm_to_vmem [thread:$0]  %s4793_s5, 8192, %s68_s27, [#allocation9], %s4599_s2, %s4599_s2, %s4600_s8  }
  0x56   :  { %4582 = dma.done.wait [#allocation3], 256  }
  0x57   :  { %4583 = vsyncadd [#allocation3], 4294967040 }
  0x58   :  { %4584 = dma.done.wait [#allocation6], 16512  }
  0x59   :  { %4585 = vsyncadd [#allocation6], 4294950784 }
  0x5a   :  { %4586 = dma.done.wait [#allocation9], 40960  }
  0x5b   :  { %4587 = vsyncadd [#allocation9], 4294926336  ;;  %v95_v0 = vld [vmem:[#allocation5] sm:$0xff]  ;;  %v92_v17 = vld [vmem:[#allocation2 + $0x8] sm:$0xff]  ;;  %s4601_s17 = smov [#allocation11]  }
  0x5c   :  { %v99_v1 = vld [vmem:[#allocation5 + $0x20] sm:$0xff]  ;;  %v4702_v18 = vpack.c.bf16 %v92_v17, %v92_v17  ;;  %v97_v31 = vld [vmem:[#allocation5 + $0x10] sm:$0xff]  ;;  %s3465_s18 = sshll.u32 %s4601_s17, 4  ;;  %s3466_s18 = int_to_ptr.vmem [resolvable:$true] %s3465_s18 }
  0x5d   :  { %v103_v2 = vld [vmem:[#allocation5 + $0x40] sm:$0xff]  ;;  %v3477_v3 = vcombine.high %v95_v0, %v99_v1  ;;  %v3476_v4 = vcombine.low %v95_v0, %v99_v1  ;;  %v101_v32 = vld [vmem:[#allocation5 + $0x30] sm:$0xff]  ;;  %s4560_s19 = scalar_lea.vmem %s3466_s18, 256  ;;  %p4565_p13 = scmp.lt.s32.totalorder %s3466_s18, %s3466_s18 }
  0x5e   :  { %v107_v5 = vld [vmem:[#allocation5 + $0x60] sm:$0xff]  ;;  %937 = vmatprep.mubr.bf16.mxu1 %v4702_v18  ;;  %1019 = vmatprep.mubr.bf16.mxu0 %v4702_v18  ;;  %v105_v33 = vld [vmem:[#allocation5 + $0x50] sm:$0xff]  ;;  %v3481_v34 = vcombine.high %v97_v31, %v101_v32  ;;  %v3480_v35 = vcombine.low %v97_v31, %v101_v32  ;;  %p4561_p12 = scmp.ne.s32.totalorder %s3466_s18, %s4560_s19  ;;  %p4566_p0 = scmp.lt.s32.totalorder %s4560_s19, %s4560_s19 }
  0x5f   :  { %v3485_v6 = vcombine.high %v103_v2, %v107_v5  ;;  %v111_v7 = vld [vmem:[#allocation5 + $0x80] sm:$0xff]  ;;  %905 = vmatprep.subr.bf16.mxu1 %v3477_v3  ;;  %v3484_v9 = vcombine.low %v103_v2, %v107_v5  ;;  %v109_v36 = vld [vmem:[#allocation5 + $0x70] sm:$0xff] }
  0x60   :  { %v115_v8 = vld [vmem:[#allocation5 + $0xa0] sm:$0xff]  ;;  %906 = vmatpush1.bf16.msra.mxu1 %v3476_v4  ;;  %v3489_v38 = vcombine.high %v105_v33, %v109_v36  ;;  %v113_v39 = vld [vmem:[#allocation5 + $0x90] sm:$0xff]  ;;  %987 = vmatprep.subr.bf16.mxu0 %v3481_v34  ;;  %v3488_v44 = vcombine.low %v105_v33, %v109_v36  ;;  %p4567_p1 = por %p4566_p0, %p4565_p13 }
  0x61   :  { %907 = vmatprep.subr.bf16.mxu1 %v3485_v6  ;;  %v3493_v10 = vcombine.high %v111_v7, %v115_v8  ;;  %v119_v11 = vld [vmem:[#allocation5 + $0xc0] sm:$0xff]  ;;  %v3492_v13 = vcombine.low %v111_v7, %v115_v8  ;;  %v117_v40 = vld [vmem:[#allocation5 + $0xb0] sm:$0xff]  ;;  %988 = vmatpush1.bf16.msra.mxu0 %v3480_v35 }
  0x62   :  { %v123_v12 = vld [vmem:[#allocation5 + $0xe0] sm:$0xff]  ;;  %989 = vmatprep.subr.bf16.mxu0 %v3489_v38  ;;  %v3497_v45 = vcombine.high %v113_v39, %v117_v40  ;;  %v121_v47 = vld [vmem:[#allocation5 + $0xd0] sm:$0xff]  ;;  %v3496_v52 = vcombine.low %v113_v39, %v117_v40  ;;  %v96_v40 = vld [vmem:[#allocation5 + $0x8] sm:$0xff]  ;;  %p4568_p2 = pnand %p4567_p1, %p4561_p12 }
  0x63   :  { %v3501_v14 = vcombine.high %v119_v11, %v123_v12  ;;  %v127_v15 = vld [vmem:[#allocation5 + $0x100] sm:$0xff]  ;;  %v3500_v19 = vcombine.low %v119_v11, %v123_v12  ;;  %v125_v48 = vld [vmem:[#allocation5 + $0xf0] sm:$0xff] }
  0x64   :  { %908 = vmatpush1.bf16.msra.mxu1 %v3484_v9  ;;  %v131_v16 = vld [vmem:[#allocation5 + $0x120] sm:$0xff]  ;;  %v3505_v53 = vcombine.high %v121_v47, %v125_v48  ;;  %v129_v55 = vld [vmem:[#allocation5 + $0x110] sm:$0xff]  ;;  %v3504_v60 = vcombine.low %v121_v47, %v125_v48 }
  0x65   :  { %909 = vmatprep.subr.bf16.mxu1 %v3493_v10  ;;  %v3509_v20 = vcombine.high %v127_v15, %v131_v16  ;;  %v135_v21 = vld [vmem:[#allocation5 + $0x140] sm:$0xff]  ;;  %v3508_v23 = vcombine.low %v127_v15, %v131_v16  ;;  %990 = vmatpush1.bf16.msra.mxu0 %v3488_v44  ;;  %v133_v56 = vld [vmem:[#allocation5 + $0x130] sm:$0xff] }
  0x66   :  { %v139_v22 = vld [vmem:[#allocation5 + $0x160] sm:$0xff]  ;;  %991 = vmatprep.subr.bf16.mxu0 %v3497_v45  ;;  %v3513_v61 = vcombine.high %v129_v55, %v133_v56  ;;  %v137_v63 = vld [vmem:[#allocation5 + $0x150] sm:$0xff]  ;;  %v3512_v4 = vcombine.low %v129_v55, %v133_v56 }
  0x67   :  { %v3517_v24 = vcombine.high %v135_v21, %v139_v22  ;;  %v143_v25 = vld [vmem:[#allocation5 + $0x180] sm:$0xff]  ;;  %v3516_v27 = vcombine.low %v135_v21, %v139_v22  ;;  %v141_v0 = vld [vmem:[#allocation5 + $0x170] sm:$0xff] }
  0x68   :  { %910 = vmatpush1.bf16.msra.mxu1 %v3492_v13  ;;  %v147_v26 = vld [vmem:[#allocation5 + $0x1a0] sm:$0xff]  ;;  %v3521_v5 = vcombine.high %v137_v63, %v141_v0  ;;  %v145_v9 = vld [vmem:[#allocation5 + $0x190] sm:$0xff]  ;;  %v3520_v12 = vcombine.low %v137_v63, %v141_v0 }
  0x69   :  { %911 = vmatprep.subr.bf16.mxu1 %v3501_v14  ;;  %v3525_v28 = vcombine.high %v143_v25, %v147_v26  ;;  %v151_v29 = vld [vmem:[#allocation5 + $0x1c0] sm:$0xff]  ;;  %v3524_v37 = vcombine.low %v143_v25, %v147_v26  ;;  %992 = vmatpush1.bf16.msra.mxu0 %v3496_v52  ;;  %v149_v10 = vld [vmem:[#allocation5 + $0x1b0] sm:$0xff] }
  0x6a   :  { %v155_v30 = vld [vmem:[#allocation5 + $0x1e0] sm:$0xff]  ;;  %993 = vmatprep.subr.bf16.mxu0 %v3505_v53  ;;  %v3529_v13 = vcombine.high %v145_v9, %v149_v10  ;;  %v153_v17 = vld [vmem:[#allocation5 + $0x1d0] sm:$0xff]  ;;  %v3528_v21 = vcombine.low %v145_v9, %v149_v10  ;;  %v128_v10 = vld [vmem:[#allocation5 + $0x108] sm:$0xff] }
  0x6b   :  { %v3533_v41 = vcombine.high %v151_v29, %v155_v30  ;;  %v159_v42 = vld [vmem:[#allocation5 + $0x200] sm:$0xff]  ;;  %v3532_v46 = vcombine.low %v151_v29, %v155_v30  ;;  %v161_v26 = vld [vmem:[#allocation5 + $0x210] sm:$0xff] }
  0x6c   :  { %912 = vmatpush1.bf16.msra.mxu1 %v3500_v19  ;;  %v163_v43 = vld [vmem:[#allocation5 + $0x220] sm:$0xff]  ;;  %v157_v19 = vld [vmem:[#allocation5 + $0x1f0] sm:$0xff] }
  0x6d   :  { %913 = vmatprep.subr.bf16.mxu1 %v3509_v20  ;;  %v3541_v49 = vcombine.high %v159_v42, %v163_v43  ;;  %v167_v50 = vld [vmem:[#allocation5 + $0x240] sm:$0xff]  ;;  %v3540_v54 = vcombine.low %v159_v42, %v163_v43  ;;  %994 = vmatpush1.bf16.msra.mxu0 %v3504_v60  ;;  %v3537_v22 = vcombine.high %v153_v17, %v157_v19  ;;  %v169_v34 = vld [vmem:[#allocation5 + $0x250] sm:$0xff] }
  0x6e   :  { %v171_v51 = vld [vmem:[#allocation5 + $0x260] sm:$0xff]  ;;  %995 = vmatprep.subr.bf16.mxu0 %v3513_v61  ;;  %v3536_v29 = vcombine.low %v153_v17, %v157_v19  ;;  %v173_v35 = vld [vmem:[#allocation5 + $0x270] sm:$0xff]  ;;  %v136_v19 = vld [vmem:[#allocation5 + $0x148] sm:$0xff] }
  0x6f   :  { %v3549_v57 = vcombine.high %v167_v50, %v171_v51  ;;  %v175_v58 = vld [vmem:[#allocation5 + $0x280] sm:$0xff]  ;;  %v3548_v62 = vcombine.low %v167_v50, %v171_v51  ;;  %v3553_v38 = vcombine.high %v169_v34, %v173_v35  ;;  %v177_v42 = vld [vmem:[#allocation5 + $0x290] sm:$0xff]  ;;  %v108_v50 = vld [vmem:[#allocation5 + $0x68] sm:$0xff] }
  0x70   :  { %914 = vmatpush1.bf16.msra.mxu1 %v3508_v23  ;;  %v179_v59 = vld [vmem:[#allocation5 + $0x2a0] sm:$0xff]  ;;  %v181_v43 = vld [vmem:[#allocation5 + $0x2b0] sm:$0xff] }
  0x71   :  { %915 = vmatprep.subr.bf16.mxu1 %v3517_v24  ;;  %v3557_v1 = vcombine.high %v175_v58, %v179_v59  ;;  %v183_v2 = vld [vmem:[#allocation5 + $0x2c0] sm:$0xff]  ;;  %v3556_v6 = vcombine.low %v175_v58, %v179_v59  ;;  %996 = vmatpush1.bf16.msra.mxu0 %v3512_v4  ;;  %v91_v45 = vld [vmem:[#allocation2] sm:$0xff]  ;;  %v3561_v47 = vcombine.high %v177_v42, %v181_v43  ;;  %v112_v58 = vld [vmem:[#allocation5 + $0x88] sm:$0xff] }
  0x72   :  { %v187_v3 = vld [vmem:[#allocation5 + $0x2e0] sm:$0xff]  ;;  %997 = vmatprep.subr.bf16.mxu0 %v3521_v5  ;;  %v185_v51 = vld [vmem:[#allocation5 + $0x2d0] sm:$0xff]  ;;  %v4706_v55 = vpack.c.bf16 %v91_v45, %v91_v45  ;;  %v168_v45 = vld [vmem:[#allocation5 + $0x248] sm:$0xff] }
  0x73   :  { %v191_v7 = vld [vmem:[#allocation5 + $0x300] sm:$0xff]  ;;  %v3565_v11 = vcombine.high %v183_v2, %v187_v3  ;;  %v3564_v14 = vcombine.low %v183_v2, %v187_v3  ;;  %v189_v52 = vld [vmem:[#allocation5 + $0x2f0] sm:$0xff]  ;;  %v120_v2 = vld [vmem:[#allocation5 + $0xc8] sm:$0xff] }
  0x74   :  { %916 = vmatpush1.bf16.msra.mxu1 %v3516_v27  ;;  %v195_v8 = vld [vmem:[#allocation5 + $0x320] sm:$0xff]  ;;  %v165_v27 = vld [vmem:[#allocation5 + $0x230] sm:$0xff]  ;;  %v3569_v56 = vcombine.high %v185_v51, %v189_v52  ;;  %v3568_v63 = vcombine.low %v185_v51, %v189_v52  ;;  %v176_v51 = vld [vmem:[#allocation5 + $0x288] sm:$0xff] }
  0x75   :  { %917 = vmatprep.subr.bf16.mxu1 %v3525_v28  ;;  %v199_v15 = vld [vmem:[#allocation5 + $0x340] sm:$0xff]  ;;  %v3573_v20 = vcombine.high %v191_v7, %v195_v8  ;;  %998 = vmatpush1.bf16.msra.mxu0 %v3520_v12  ;;  %v3572_v23 = vcombine.low %v191_v7, %v195_v8  ;;  %v3545_v30 = vcombine.high %v161_v26, %v165_v27  ;;  %v193_v59 = vld [vmem:[#allocation5 + $0x310] sm:$0xff]  ;;  %v180_v52 = vld [vmem:[#allocation5 + $0x2a8] sm:$0xff] }
  0x76   :  { %v203_v16 = vld [vmem:[#allocation5 + $0x360] sm:$0xff]  ;;  %999 = vmatprep.subr.bf16.mxu0 %v3529_v13  ;;  %v197_v60 = vld [vmem:[#allocation5 + $0x330] sm:$0xff] }
  0x77   :  { %v207_v24 = vld [vmem:[#allocation5 + $0x380] sm:$0xff]  ;;  %v3581_v28 = vcombine.high %v199_v15, %v203_v16  ;;  %v3580_v31 = vcombine.low %v199_v15, %v203_v16  ;;  %v3577_v0 = vcombine.high %v193_v59, %v197_v60  ;;  %v201_v3 = vld [vmem:[#allocation5 + $0x350] sm:$0xff]  ;;  %v3576_v7 = vcombine.low %v193_v59, %v197_v60  ;;  %v188_v59 = vld [vmem:[#allocation5 + $0x2e8] sm:$0xff] }
  0x78   :  { %918 = vmatpush1.bf16.msra.mxu1 %v3524_v37  ;;  %v211_v25 = vld [vmem:[#allocation5 + $0x3a0] sm:$0xff]  ;;  %v3544_v37 = vcombine.low %v161_v26, %v165_v27  ;;  %v205_v4 = vld [vmem:[#allocation5 + $0x370] sm:$0xff]  ;;  %v144_v27 = vld [vmem:[#allocation5 + $0x188] sm:$0xff] }
  0x79   :  { %919 = vmatprep.subr.bf16.mxu1 %v3533_v41  ;;  %1000 = vmatpush1.bf16.msra.mxu0 %v3528_v21  ;;  %v215_v32 = vld [vmem:[#allocation5 + $0x3c0] sm:$0xff]  ;;  %v3589_v36 = vcombine.high %v207_v24, %v211_v25  ;;  %v3588_v39 = vcombine.low %v207_v24, %v211_v25  ;;  %v100_v41 = vld [vmem:[#allocation5 + $0x28] sm:$0xff]  ;;  %v3585_v8 = vcombine.high %v201_v3, %v205_v4  ;;  %v213_v12 = vld [vmem:[#allocation5 + $0x3b0] sm:$0xff] }
  0x7a   :  { %1001 = vmatprep.subr.bf16.mxu0 %v3537_v22  ;;  %v219_v33 = vld [vmem:[#allocation5 + $0x3e0] sm:$0xff]  ;;  %v3479_v53 = vcombine.high %v96_v40, %v100_v41  ;;  %v3584_v15 = vcombine.low %v201_v3, %v205_v4  ;;  %v221_v21 = vld [vmem:[#allocation5 + $0x3f0] sm:$0xff]  ;;  %v3994_v60 = vld [vmem:[#allocation8 + $0x80] ss:$16 sps:$4 sm:$0xff]  }
  0x7b   :  { %v3597_v44 = vcombine.high %v215_v32, %v219_v33  ;;  %v3596_v48 = vcombine.low %v215_v32, %v219_v33  ;;  %v152_v33 = vld [vmem:[#allocation5 + $0x1c8] sm:$0xff] }
  0x7c   :  { %920 = vmatpush1.bf16.msra.mxu1 %v3532_v46  ;;  %v3552_v46 = vcombine.low %v169_v34, %v173_v35  ;;  %v156_v34 = vld [vmem:[#allocation5 + $0x1e8] sm:$0xff] }
  0x7d   :  { %921 = vmatprep.subr.bf16.mxu1 %v3541_v49  ;;  %1002 = vmatpush1.bf16.msra.mxu0 %v3536_v29  ;;  %v104_v49 = vld [vmem:[#allocation5 + $0x48] sm:$0xff] }
  0x7e   :  { %1003 = vmatprep.subr.bf16.mxu0 %v3545_v30  ;;  %v3487_v61 = vcombine.high %v104_v49, %v108_v50  ;;  %v3972_v30 = vld [vmem:[#allocation8 + $0x4] ss:$16 sps:$4 sm:$0xff]   ;;  %v3970_v35 = vld [vmem:[#allocation8] ss:$16 sps:$4 sm:$0xff]  }
  0x7f   :  { %v4008_v4 = vld [vmem:[#allocation8 + $0xc4] ss:$16 sps:$4 sm:$0xff]  }
  0x80   :  { %922 = vmatpush1.bf16.msra.mxu1 %v3540_v54  ;;  %v3560_v54 = vcombine.low %v177_v42, %v181_v43  ;;  %v3535_v42 = vcombine.high %v152_v33, %v156_v34  ;;  %v3984_v43 = vld [vmem:[#allocation8 + $0x44] ss:$16 sps:$4 sm:$0xff]  }
  0x81   :  { %923 = vmatprep.subr.bf16.mxu1 %v3549_v57  ;;  %1004 = vmatpush1.bf16.msra.mxu0 %v3544_v37  ;;  %v3478_v57 = vcombine.low %v96_v40, %v100_v41  ;;  %v3978_v37 = vld [vmem:[#allocation8 + $0x24] ss:$16 sps:$4 sm:$0xff]   ;;  %v3976_v41 = vld [vmem:[#allocation8 + $0x20] ss:$16 sps:$4 sm:$0xff]  }
  0x82   :  { %1005 = vmatprep.subr.bf16.mxu0 %v3553_v38  ;;  %v164_v40 = vld [vmem:[#allocation5 + $0x228] sm:$0xff] }
  0x84   :  { %924 = vmatpush1.bf16.msra.mxu1 %v3548_v62  ;;  %v116_v62 = vld [vmem:[#allocation5 + $0xa8] sm:$0xff] }
  0x85   :  { %925 = vmatprep.subr.bf16.mxu1 %v3557_v1  ;;  %1006 = vmatpush1.bf16.msra.mxu0 %v3552_v46  ;;  %v3486_v1 = vcombine.low %v104_v49, %v108_v50  ;;  %v3495_v5 = vcombine.high %v112_v58, %v116_v62  ;;  %v3494_v9 = vcombine.low %v112_v58, %v116_v62  ;;  %v172_v46 = vld [vmem:[#allocation5 + $0x268] sm:$0xff] }
  0x86   :  { %1007 = vmatprep.subr.bf16.mxu0 %v3561_v47  ;;  %v3982_v47 = vld [vmem:[#allocation8 + $0x40] ss:$16 sps:$4 sm:$0xff]   ;;  %v3990_v49 = vld [vmem:[#allocation8 + $0x64] ss:$16 sps:$4 sm:$0xff]  }
  0x87   :  { %v184_v58 = vld [vmem:[#allocation5 + $0x2c8] sm:$0xff] }
  0x88   :  { %926 = vmatpush1.bf16.msra.mxu1 %v3556_v6  ;;  %v124_v6 = vld [vmem:[#allocation5 + $0xe8] sm:$0xff]  ;;  %v3567_v3 = vcombine.high %v184_v58, %v188_v59 }
  0x89   :  { %927 = vmatprep.subr.bf16.mxu1 %v3565_v11  ;;  %1008 = vmatpush1.bf16.msra.mxu0 %v3560_v54  ;;  %v209_v11 = vld [vmem:[#allocation5 + $0x390] sm:$0xff]  ;;  %v3503_v13 = vcombine.high %v120_v2, %v124_v6  ;;  %v3502_v17 = vcombine.low %v120_v2, %v124_v6  ;;  %v3551_v54 = vcombine.high %v168_v45, %v172_v46  ;;  %v4002_v62 = vld [vmem:[#allocation8 + $0xa4] ss:$16 sps:$4 sm:$0xff]   ;;  %v4000_v2 = vld [vmem:[#allocation8 + $0xa0] ss:$16 sps:$4 sm:$0xff]  }
  0x8a   :  { %1009 = vmatprep.subr.bf16.mxu0 %v3569_v56  ;;  %v3593_v16 = vcombine.high %v209_v11, %v213_v12  ;;  %v3592_v24 = vcombine.low %v209_v11, %v213_v12  ;;  %v3996_v56 = vld [vmem:[#allocation8 + $0x84] ss:$16 sps:$4 sm:$0xff]  }
  0x8b   :  { %v200_v6 = vld [vmem:[#allocation5 + $0x348] sm:$0xff] }
  0x8c   :  { %928 = vmatpush1.bf16.msra.mxu1 %v3564_v14  ;;  %v132_v14 = vld [vmem:[#allocation5 + $0x128] sm:$0xff] }
  0x8d   :  { %929 = vmatprep.subr.bf16.mxu1 %v3573_v20  ;;  %1010 = vmatpush1.bf16.msra.mxu0 %v3568_v63  ;;  %v217_v20 = vld [vmem:[#allocation5 + $0x3d0] sm:$0xff]  ;;  %v3511_v22 = vcombine.high %v128_v10, %v132_v14  ;;  %v3510_v26 = vcombine.low %v128_v10, %v132_v14  ;;  %v3558_v63 = vcombine.low %v176_v51, %v180_v52  ;;  %v4014_v10 = vld [vmem:[#allocation8 + $0xe4] ss:$16 sps:$4 sm:$0xff]   ;;  %v4012_v14 = vld [vmem:[#allocation8 + $0xe0] ss:$16 sps:$4 sm:$0xff]  }
  0x8e   :  { %1011 = vmatprep.subr.bf16.mxu0 %v3577_v0  ;;  %v3601_v25 = vcombine.high %v217_v20, %v221_v21  ;;  %v192_v0 = vld [vmem:[#allocation5 + $0x308] sm:$0xff] }
  0x8f   :  { %v208_v12 = vld [vmem:[#allocation5 + $0x388] sm:$0xff] }
  0x90   :  { %930 = vmatpush1.bf16.msra.mxu1 %v3572_v23  ;;  %v140_v23 = vld [vmem:[#allocation5 + $0x168] sm:$0xff] }
  0x91   :  { %931 = vmatprep.subr.bf16.mxu1 %v3581_v28  ;;  %1012 = vmatpush1.bf16.msra.mxu0 %v3576_v7  ;;  %v148_v28 = vld [vmem:[#allocation5 + $0x1a8] sm:$0xff]  ;;  %v3519_v29 = vcombine.high %v136_v19, %v140_v23  ;;  %v3518_v32 = vcombine.low %v136_v19, %v140_v23 }
  0x92   :  { %1013 = vmatprep.subr.bf16.mxu0 %v3585_v8  ;;  %v3526_v38 = vcombine.low %v144_v27, %v148_v28  ;;  %v204_v7 = vld [vmem:[#allocation5 + $0x368] sm:$0xff] }
  0x93   :  { %v4006_v8 = vld [vmem:[#allocation8 + $0xc0] ss:$16 sps:$4 sm:$0xff]   ;;  %v4026_v23 = vld [vmem:[#allocation8 + $0x124] ss:$16 sps:$4 sm:$0xff]  }
  0x94   :  { %932 = vmatpush1.bf16.msra.mxu1 %v3580_v31  ;;  %v3600_v31 = vcombine.low %v217_v20, %v221_v21  ;;  %v216_v19 = vld [vmem:[#allocation5 + $0x3c8] sm:$0xff] }
  0x95   :  { %933 = vmatprep.subr.bf16.mxu1 %v3589_v36  ;;  %1014 = vmatpush1.bf16.msra.mxu0 %v3584_v15  ;;  %v3527_v36 = vcombine.high %v144_v27, %v148_v28  ;;  %v3583_v15 = vcombine.high %v200_v6, %v204_v7  ;;  %v220_v20 = vld [vmem:[#allocation5 + $0x3e8] sm:$0xff] }
  0x96   :  { %1015 = vmatprep.subr.bf16.mxu0 %v3593_v16  ;;  %v4020_v16 = vld [vmem:[#allocation8 + $0x104] ss:$16 sps:$4 sm:$0xff]   ;;  %v4018_v21 = vld [vmem:[#allocation8 + $0x100] ss:$16 sps:$4 sm:$0xff]   ;;  %v3599_v28 = vcombine.high %v216_v19, %v220_v20 }
  0x97   :  { %v4024_v27 = vld [vmem:[#allocation8 + $0x120] ss:$16 sps:$4 sm:$0xff]  }
  0x98   :  { %934 = vmatpush1.bf16.msra.mxu1 %v3588_v39  ;;  %v160_v39 = vld [vmem:[#allocation5 + $0x208] sm:$0xff] }
  0x99   :  { %935 = vmatprep.subr.bf16.mxu1 %v3597_v44  ;;  %1016 = vmatpush1.bf16.msra.mxu0 %v3592_v24  ;;  %v3534_v44 = vcombine.low %v152_v33, %v156_v34  ;;  %v3542_v50 = vcombine.low %v160_v39, %v164_v40  ;;  %v4030_v33 = vld [vmem:[#allocation8 + $0x140] ss:$16 sps:$4 sm:$0xff]  }
  0x9a   :  { %1017 = vmatprep.subr.bf16.mxu0 %v3601_v25  ;;  %v98_v25 = vld [vmem:[#allocation5 + $0x18] sm:$0xff] }
  0x9c   :  { %936 = vmatpush1.bf16.msra.mxu1 %v3596_v48  ;;  %v3543_v48 = vcombine.high %v160_v39, %v164_v40  ;;  %v4036_v39 = vld [vmem:[#allocation8 + $0x160] ss:$16 sps:$4 sm:$0xff]  }
  0x9d   :  { %946 = vmatprep.subr.bf16.mxu1 %v3479_v53  ;;  %1018 = vmatpush1.bf16.msra.mxu0 %v3600_v31  ;;  %v3988_v53 = vld [vmem:[#allocation8 + $0x60] ss:$16 sps:$4 sm:$0xff]  }
  0x9e   :  { %2643 = vmatprep.subr.bf16.mxu0 %v3972_v30  ;;  %v3598_v30 = vcombine.low %v216_v19, %v220_v20  ;;  %v106_v31 = vld [vmem:[#allocation5 + $0x58] sm:$0xff] }
  0x9f   :  { %938 = vmatmul.mubr.bf16.vlgmr.msra.gmra.mrb[0].mxu1 %v4706_v55 }
  0xa0   :  { %947 = vmatpush1.bf16.msra.mxu1 %v3478_v57  ;;  %978 = vmatprep.mubr.bf16.mxu1 %v4702_v18  ;;  %v3550_v57 = vcombine.low %v168_v45, %v172_v46  ;;  %v4042_v45 = vld [vmem:[#allocation8 + $0x180] ss:$16 sps:$4 sm:$0xff]  }
  0xa1   :  { %948 = vmatprep.subr.bf16.mxu1 %v3487_v61  ;;  %1020 = vmatmul.mubr.bf16.vlgmr.msra.gmra.mrb[0].mxu0 %v4706_v55  ;;  %v3559_v61 = vcombine.high %v176_v51, %v180_v52  ;;  %v4048_v51 = vld [vmem:[#allocation8 + $0x1a0] ss:$16 sps:$4 sm:$0xff]  }
  0xa2   :  { %2644 = vmatpush1.bf16.msra.mxu0 %v3970_v35  ;;  %v4038_v35 = vld [vmem:[#allocation8 + $0x164] ss:$16 sps:$4 sm:$0xff]  }
  0xa3   :  { %2645 = vmatprep.subr.bf16.mxu0 %v3978_v37  ;;  %v114_v37 = vld [vmem:[#allocation5 + $0x98] sm:$0xff] }
  0xa4   :  { %949 = vmatpush1.bf16.msra.mxu1 %v3486_v1  ;;  %v196_v1 = vld [vmem:[#allocation5 + $0x328] sm:$0xff] }
  0xa5   :  { %950 = vmatprep.subr.bf16.mxu1 %v3495_v5  ;;  %v3566_v5 = vcombine.low %v184_v58, %v188_v59  ;;  %v3574_v11 = vcombine.low %v192_v0, %v196_v1  ;;  %v146_v58 = vld [vmem:[#allocation5 + $0x198] sm:$0xff] }
  0xa6   :  { %2646 = vmatpush1.bf16.msra.mxu0 %v3976_v41  ;;  %v4044_v41 = vld [vmem:[#allocation8 + $0x184] ss:$16 sps:$4 sm:$0xff]  }
  0xa7   :  { %2647 = vmatprep.subr.bf16.mxu0 %v3984_v43  ;;  %v122_v43 = vld [vmem:[#allocation5 + $0xd8] sm:$0xff] }
  0xa8   :  { %951 = vmatpush1.bf16.msra.mxu1 %v3494_v9  ;;  %v3575_v9 = vcombine.high %v192_v0, %v196_v1  ;;  %v150_v59 = vld [vmem:[#allocation5 + $0x1b8] sm:$0xff] }
  0xa9   :  { %952 = vmatprep.subr.bf16.mxu1 %v3503_v13  ;;  %v212_v13 = vld [vmem:[#allocation5 + $0x3a8] sm:$0xff]  ;;  %v3531_v0 = vcombine.high %v146_v58, %v150_v59  ;;  %v158_v1 = vld [vmem:[#allocation5 + $0x1f8] sm:$0xff] }
  0xaa   :  { %2648 = vmatpush1.bf16.msra.mxu0 %v3982_v47  ;;  %v3590_v24 = vcombine.low %v208_v12, %v212_v13  ;;  %v4050_v47 = vld [vmem:[#allocation8 + $0x1a4] ss:$16 sps:$4 sm:$0xff]  }
  0xab   :  { %2649 = vmatprep.subr.bf16.mxu0 %v3990_v49  ;;  %v130_v49 = vld [vmem:[#allocation5 + $0x118] sm:$0xff] }
  0xac   :  { %953 = vmatpush1.bf16.msra.mxu1 %v3502_v17  ;;  %v3582_v17 = vcombine.low %v200_v6, %v204_v7  ;;  %v166_v7 = vld [vmem:[#allocation5 + $0x238] sm:$0xff] }
  0xad   :  { %954 = vmatprep.subr.bf16.mxu1 %v3511_v22  ;;  %v3591_v22 = vcombine.high %v208_v12, %v212_v13  ;;  %v170_v12 = vld [vmem:[#allocation5 + $0x258] sm:$0xff] }
  0xae   :  { %2650 = vmatpush1.bf16.msra.mxu0 %v3988_v53  ;;  %v174_v13 = vld [vmem:[#allocation5 + $0x278] sm:$0xff] }
  0xaf   :  { %2651 = vmatprep.subr.bf16.mxu0 %v3996_v56  ;;  %v142_v56 = vld [vmem:[#allocation5 + $0x178] sm:$0xff]  ;;  %v3554_v19 = vcombine.low %v170_v12, %v174_v13 }
  0xb0   :  { %955 = vmatpush1.bf16.msra.mxu1 %v3510_v26  ;;  %v102_v26 = vld [vmem:[#allocation5 + $0x38] sm:$0xff] }
  0xb1   :  { %956 = vmatprep.subr.bf16.mxu1 %v3519_v29  ;;  %v4032_v29 = vld [vmem:[#allocation8 + $0x144] ss:$16 sps:$4 sm:$0xff]   ;;  %v3483_v34 = vcombine.high %v98_v25, %v102_v26 }
  0xb2   :  { %2652 = vmatpush1.bf16.msra.mxu0 %v3994_v60 }
  0xb3   :  { %2653 = vmatprep.subr.bf16.mxu0 %v4002_v62  ;;  %v154_v62 = vld [vmem:[#allocation5 + $0x1d8] sm:$0xff] }
  0xb4   :  { %957 = vmatpush1.bf16.msra.mxu1 %v3518_v32  ;;  %v110_v32 = vld [vmem:[#allocation5 + $0x78] sm:$0xff]  ;;  %v3539_v6 = vcombine.high %v154_v62, %v158_v1 }
  0xb5   :  { %958 = vmatprep.subr.bf16.mxu1 %v3527_v36  ;;  %v3482_v36 = vcombine.low %v98_v25, %v102_v26  ;;  %v3491_v40 = vcombine.high %v106_v31, %v110_v32  ;;  %v194_v25 = vld [vmem:[#allocation5 + $0x318] sm:$0xff] }
  0xb6   :  { %2654 = vmatpush1.bf16.msra.mxu0 %v4000_v2  ;;  %v4054_v2 = vld [vmem:[#allocation8 + $0x1c0] ss:$16 sps:$4 sm:$0xff]  }
  0xb7   :  { %2655 = vmatprep.subr.bf16.mxu0 %v4008_v4  ;;  %v162_v4 = vld [vmem:[#allocation5 + $0x218] sm:$0xff] }
  0xb8   :  { %959 = vmatpush1.bf16.msra.mxu1 %v3526_v38  ;;  %v118_v38 = vld [vmem:[#allocation5 + $0xb8] sm:$0xff] }
  0xb9   :  { %960 = vmatprep.subr.bf16.mxu1 %v3535_v42  ;;  %v3490_v42 = vcombine.low %v106_v31, %v110_v32  ;;  %v3499_v46 = vcombine.high %v114_v37, %v118_v38  ;;  %v198_v26 = vld [vmem:[#allocation5 + $0x338] sm:$0xff] }
  0xba   :  { %2656 = vmatpush1.bf16.msra.mxu0 %v4006_v8  ;;  %v4060_v8 = vld [vmem:[#allocation8 + $0x1e0] ss:$16 sps:$4 sm:$0xff]   ;;  %v3578_v31 = vcombine.low %v194_v25, %v198_v26 }
  0xbb   :  { %2657 = vmatprep.subr.bf16.mxu0 %v4014_v10  ;;  %v4068_v10 = vld [vmem:[#allocation8 + $0x204] ss:$16 sps:$4 sm:$0xff]  }
  0xbc   :  { %961 = vmatpush1.bf16.msra.mxu1 %v3534_v44  ;;  %v126_v44 = vld [vmem:[#allocation5 + $0xf8] sm:$0xff] }
  0xbd   :  { %962 = vmatprep.subr.bf16.mxu1 %v3543_v48  ;;  %v3498_v48 = vcombine.low %v114_v37, %v118_v38  ;;  %v3507_v52 = vcombine.high %v122_v43, %v126_v44  ;;  %v3506_v53 = vcombine.low %v122_v43, %v126_v44  ;;  %v218_v37 = vld [vmem:[#allocation5 + $0x3d8] sm:$0xff]  ;;  %v3973_v43 = vld [vmem:[#allocation8 + $0x8] ss:$16 sps:$4 sm:$0xff]   ;;  %v3981_v44 = vld [vmem:[#allocation8 + $0x2c] ss:$16 sps:$4 sm:$0xff]  }
  0xbe   :  { %2658 = vmatpush1.bf16.msra.mxu0 %v4012_v14  ;;  %v3546_v14 = vcombine.low %v162_v4, %v166_v7  ;;  %v222_v38 = vld [vmem:[#allocation5 + $0x3f8] sm:$0xff] }
  0xbf   :  { %2659 = vmatprep.subr.bf16.mxu0 %v4020_v16  ;;  %v178_v16 = vld [vmem:[#allocation5 + $0x298] sm:$0xff] }
  0xc0   :  { %963 = vmatpush1.bf16.msra.mxu1 %v3542_v50  ;;  %v134_v50 = vld [vmem:[#allocation5 + $0x138] sm:$0xff] }
  0xc1   :  { %964 = vmatprep.subr.bf16.mxu1 %v3551_v54  ;;  %v138_v54 = vld [vmem:[#allocation5 + $0x158] sm:$0xff] }
  0xc2   :  { %2660 = vmatpush1.bf16.msra.mxu0 %v4018_v21  ;;  %v3523_v60 = vcombine.high %v138_v54, %v142_v56  ;;  %v186_v21 = vld [vmem:[#allocation5 + $0x2d8] sm:$0xff] }
  0xc3   :  { %2661 = vmatprep.subr.bf16.mxu0 %v4026_v23 }
  0xc4   :  { %965 = vmatpush1.bf16.msra.mxu1 %v3550_v57  ;;  %v3514_v57 = vcombine.low %v130_v49, %v134_v50 }
  0xc5   :  { %966 = vmatprep.subr.bf16.mxu1 %v3559_v61  ;;  %v3522_v61 = vcombine.low %v138_v54, %v142_v56  ;;  %v4009_v54 = vld [vmem:[#allocation8 + $0xc8] ss:$16 sps:$4 sm:$0xff]   ;;  %v4017_v56 = vld [vmem:[#allocation8 + $0xec] ss:$16 sps:$4 sm:$0xff]  }
  0xc6   :  { %2662 = vmatpush1.bf16.msra.mxu0 %v4024_v27 }
  0xc7   :  { %2663 = vmatprep.subr.bf16.mxu0 %v4032_v29  ;;  %v202_v29 = vld [vmem:[#allocation5 + $0x358] sm:$0xff] }
  0xc8   :  { %967 = vmatpush1.bf16.msra.mxu1 %v3558_v63  ;;  %v4056_v63 = vld [vmem:[#allocation8 + $0x1c4] ss:$16 sps:$4 sm:$0xff]  }
  0xc9   :  { %968 = vmatprep.subr.bf16.mxu1 %v3567_v3  ;;  %v3530_v3 = vcombine.low %v146_v58, %v150_v59  ;;  %v4021_v58 = vld [vmem:[#allocation8 + $0x108] ss:$16 sps:$4 sm:$0xff]   ;;  %v4029_v59 = vld [vmem:[#allocation8 + $0x12c] ss:$16 sps:$4 sm:$0xff]  }
  0xca   :  { %2664 = vmatpush1.bf16.msra.mxu0 %v4030_v33  ;;  %v210_v33 = vld [vmem:[#allocation5 + $0x398] sm:$0xff] }
  0xcb   :  { %2665 = vmatprep.subr.bf16.mxu0 %v4038_v35 }
  0xcc   :  { %969 = vmatpush1.bf16.msra.mxu1 %v3566_v5  ;;  %v4062_v5 = vld [vmem:[#allocation8 + $0x1e4] ss:$16 sps:$4 sm:$0xff]  }
  0xcd   :  { %970 = vmatprep.subr.bf16.mxu1 %v3575_v9  ;;  %v3538_v9 = vcombine.low %v154_v62, %v158_v1  ;;  %v4033_v62 = vld [vmem:[#allocation8 + $0x148] ss:$16 sps:$4 sm:$0xff]   ;;  %v4047_v1 = vld [vmem:[#allocation8 + $0x18c] ss:$16 sps:$4 sm:$0xff]  }
  0xce   :  { %2666 = vmatpush1.bf16.msra.mxu0 %v4036_v39 }
  0xcf   :  { %2667 = vmatprep.subr.bf16.mxu0 %v4044_v41  ;;  %v3602_v41 = vcombine.low %v218_v37, %v222_v38 }
  0xd0   :  { %971 = vmatpush1.bf16.msra.mxu1 %v3574_v11  ;;  %v3547_v11 = vcombine.high %v162_v4, %v166_v7  ;;  %v4051_v4 = vld [vmem:[#allocation8 + $0x1a8] ss:$16 sps:$4 sm:$0xff]   ;;  %v4065_v7 = vld [vmem:[#allocation8 + $0x1ec] ss:$16 sps:$4 sm:$0xff]  }
  0xd1   :  { %972 = vmatprep.subr.bf16.mxu1 %v3583_v15  ;;  %v3555_v15 = vcombine.high %v170_v12, %v174_v13  ;;  %v4719_v13 = vld [vmem:[#allocation7] sm:$0xff] }
  0xd2   :  { %2668 = vmatpush1.bf16.msra.mxu0 %v4042_v45  ;;  %v3979_v45 = vld [vmem:[#allocation8 + $0x28] ss:$16 sps:$4 sm:$0xff]  }
  0xd3   :  { %2669 = vmatprep.subr.bf16.mxu0 %v4050_v47  ;;  %v3985_v47 = vld [vmem:[#allocation8 + $0x48] ss:$16 sps:$4 sm:$0xff]  }
  0xd4   :  { %973 = vmatpush1.bf16.msra.mxu1 %v3582_v17  ;;  %v182_v17 = vld [vmem:[#allocation5 + $0x2b8] sm:$0xff] }
  0xd5   :  { %974 = vmatprep.subr.bf16.mxu1 %v3591_v22  ;;  %v3563_v20 = vcombine.high %v178_v16, %v182_v17  ;;  %v190_v22 = vld [vmem:[#allocation5 + $0x2f8] sm:$0xff]  ;;  %v3562_v23 = vcombine.low %v178_v16, %v182_v17 }
  0xd6   :  { %2670 = vmatpush1.bf16.msra.mxu0 %v4048_v51  ;;  %v3570_v27 = vcombine.low %v186_v21, %v190_v22  ;;  %v3997_v51 = vld [vmem:[#allocation8 + $0x88] ss:$16 sps:$4 sm:$0xff]  }
  0xd7   :  { %2671 = vmatprep.subr.bf16.mxu0 %v4056_v63  ;;  %v4041_v63 = vld [vmem:[#allocation8 + $0x16c] ss:$16 sps:$4 sm:$0xff]  }
  0xd8   :  { %975 = vmatpush1.bf16.msra.mxu1 %v3590_v24  ;;  %v3571_v24 = vcombine.high %v186_v21, %v190_v22 }
  0xd9   :  { %976 = vmatprep.subr.bf16.mxu1 %v3599_v28  ;;  %v3579_v28 = vcombine.high %v194_v25, %v198_v26 }
  0xda   :  { %2672 = vmatpush1.bf16.msra.mxu0 %v4054_v2  ;;  %v4045_v2 = vld [vmem:[#allocation8 + $0x188] ss:$16 sps:$4 sm:$0xff]  }
  0xdb   :  { %2673 = vmatprep.subr.bf16.mxu0 %v4062_v5  ;;  %v4059_v5 = vld [vmem:[#allocation8 + $0x1cc] ss:$16 sps:$4 sm:$0xff]  }
  0xdc   :  { %977 = vmatpush1.bf16.msra.mxu1 %v3598_v30  ;;  %v206_v30 = vld [vmem:[#allocation5 + $0x378] sm:$0xff] }
  0xdd   :  { %1028 = vmatprep.subr.bf16.mxu1 %v3483_v34  ;;  %v3587_v32 = vcombine.high %v202_v29, %v206_v30  ;;  %v214_v34 = vld [vmem:[#allocation5 + $0x3b8] sm:$0xff]  ;;  %v3586_v35 = vcombine.low %v202_v29, %v206_v30 }
  0xde   :  { %2674 = vmatpush1.bf16.msra.mxu0 %v4060_v8  ;;  %v3594_v39 = vcombine.low %v210_v33, %v214_v34  ;;  %v4063_v8 = vld [vmem:[#allocation8 + $0x1e8] ss:$16 sps:$4 sm:$0xff]   ;;  %v4074_v30 = vld [vmem:[#allocation8 + $0x224] ss:$16 sps:$4 sm:$0xff]  }
  0xdf   :  { %979 = vmatmul.mubr.bf16.vlgmr.msra.gmra.mrb[4].mxu1 %v4706_v55  ;;  %2684 = vmatprep.subr.bf16.mxu0 %v4068_v10  ;;  %v225_v10 = vlaneseq }
  0xe0   :  { %1029 = vmatpush1.bf16.msra.mxu1 %v3482_v36  ;;  %1060 = vmatprep.mubr.bf16.mxu1 %v4702_v18  ;;  %v3515_v18 = vcombine.high %v130_v49, %v134_v50  ;;  %v3595_v36 = vcombine.high %v210_v33, %v214_v34  ;;  %v3991_v49 = vld [vmem:[#allocation8 + $0x68] ss:$16 sps:$4 sm:$0xff]   ;;  %v3999_v50 = vld [vmem:[#allocation8 + $0x8c] ss:$16 sps:$4 sm:$0xff]   ;;  %v4080_v34 = vld [vmem:[#allocation8 + $0x244] ss:$16 sps:$4 sm:$0xff]  }
  0xe1   :  { %1030 = vmatprep.subr.bf16.mxu1 %v3491_v40  ;;  %v3603_v40 = vcombine.high %v218_v37, %v222_v38  ;;  %v4075_v33 = vld [vmem:[#allocation8 + $0x228] ss:$16 sps:$4 sm:$0xff]   ;;  %v4086_v38 = vld [vmem:[#allocation8 + $0x264] ss:$16 sps:$4 sm:$0xff]  }
  0xe2   :  { %v4081_v37 = vld [vmem:[#allocation8 + $0x248] ss:$16 sps:$4 sm:$0xff]  }
  0xe4   :  { %1031 = vmatpush1.bf16.msra.mxu1 %v3490_v42  ;;  %v3975_v42 = vld [vmem:[#allocation8 + $0xc] ss:$16 sps:$4 sm:$0xff]  }
  0xe5   :  { %1032 = vmatprep.subr.bf16.mxu1 %v3499_v46  ;;  %v3987_v46 = vld [vmem:[#allocation8 + $0x4c] ss:$16 sps:$4 sm:$0xff]  }
  0xe8   :  { %1033 = vmatpush1.bf16.msra.mxu1 %v3498_v48  ;;  %v3993_v48 = vld [vmem:[#allocation8 + $0x6c] ss:$16 sps:$4 sm:$0xff]  }
  0xe9   :  { %1034 = vmatprep.subr.bf16.mxu1 %v3507_v52  ;;  %v4005_v52 = vld [vmem:[#allocation8 + $0xac] ss:$16 sps:$4 sm:$0xff]  }
  0xec   :  { %1035 = vmatpush1.bf16.msra.mxu1 %v3506_v53  ;;  %v4003_v53 = vld [vmem:[#allocation8 + $0xa8] ss:$16 sps:$4 sm:$0xff]  }
  0xed   :  { %1036 = vmatprep.subr.bf16.mxu1 %v3515_v18  ;;  %v4015_v18 = vld [vmem:[#allocation8 + $0xe8] ss:$16 sps:$4 sm:$0xff]  }
  0xf0   :  { %1037 = vmatpush1.bf16.msra.mxu1 %v3514_v57  ;;  %v4023_v57 = vld [vmem:[#allocation8 + $0x10c] ss:$16 sps:$4 sm:$0xff]  }
  0xf1   :  { %1038 = vmatprep.subr.bf16.mxu1 %v3523_v60  ;;  %v4027_v60 = vld [vmem:[#allocation8 + $0x128] ss:$16 sps:$4 sm:$0xff]  }
  0xf4   :  { %1039 = vmatpush1.bf16.msra.mxu1 %v3522_v61  ;;  %v4035_v61 = vld [vmem:[#allocation8 + $0x14c] ss:$16 sps:$4 sm:$0xff]  }
  0xf5   :  { %1040 = vmatprep.subr.bf16.mxu1 %v3531_v0  ;;  %v4039_v0 = vld [vmem:[#allocation8 + $0x168] ss:$16 sps:$4 sm:$0xff]  }
  0xf8   :  { %1041 = vmatpush1.bf16.msra.mxu1 %v3530_v3  ;;  %v4053_v3 = vld [vmem:[#allocation8 + $0x1ac] ss:$16 sps:$4 sm:$0xff]  }
  0xf9   :  { %1042 = vmatprep.subr.bf16.mxu1 %v3539_v6  ;;  %v4057_v6 = vld [vmem:[#allocation8 + $0x1c8] ss:$16 sps:$4 sm:$0xff]  }
  0xfc   :  { %1043 = vmatpush1.bf16.msra.mxu1 %v3538_v9  ;;  %v4071_v9 = vld [vmem:[#allocation8 + $0x20c] ss:$16 sps:$4 sm:$0xff]  }
  0xfd   :  { %1044 = vmatprep.subr.bf16.mxu1 %v3547_v11  ;;  %v4714_v11 = vshrl.u32 %v225_v10, 7  ;;  %v4137_v10 = vld [vmem:[#allocation8 + $0x36c] ss:$16 sps:$4 sm:$0xff]  }
  0xff   :  { %v4717_v12 = vsub.s32 0, %v4714_v11 }
 0x100   :  { %1045 = vmatpush1.bf16.msra.mxu1 %v3546_v14  ;;  %v4722_v14 = vsub.s32 1, %v4714_v11 }
 0x101   :  { %1046 = vmatprep.subr.bf16.mxu1 %v3555_v15  ;;  %v228_v15 = vrot.slane %v4719_v13, %v4717_v12 }
 0x102   :  { %v232_v16 = vrot.slane %v4719_v13, %v4722_v14 }
 0x104   :  { %1047 = vmatpush1.bf16.msra.mxu1 %v3554_v19 }
 0x105   :  { %1048 = vmatprep.subr.bf16.mxu1 %v3563_v20 }
 0x108   :  { %1049 = vmatpush1.bf16.msra.mxu1 %v3562_v23 }
 0x109   :  { %1050 = vmatprep.subr.bf16.mxu1 %v3571_v24 }
 0x10c   :  { %1051 = vmatpush1.bf16.msra.mxu1 %v3570_v27  ;;  %v4066_v27 = vld [vmem:[#allocation8 + $0x200] ss:$16 sps:$4 sm:$0xff]  }
 0x10d   :  { %1052 = vmatprep.subr.bf16.mxu1 %v3579_v28  ;;  %v4069_v28 = vld [vmem:[#allocation8 + $0x208] ss:$16 sps:$4 sm:$0xff]  }
 0x110   :  { %1053 = vmatpush1.bf16.msra.mxu1 %v3578_v31  ;;  %v4077_v31 = vld [vmem:[#allocation8 + $0x22c] ss:$16 sps:$4 sm:$0xff]  }
 0x111   :  { %1054 = vmatprep.subr.bf16.mxu1 %v3587_v32  ;;  %v4072_v32 = vld [vmem:[#allocation8 + $0x220] ss:$16 sps:$4 sm:$0xff]  }
 0x114   :  { %1055 = vmatpush1.bf16.msra.mxu1 %v3586_v35  ;;  %v4083_v35 = vld [vmem:[#allocation8 + $0x24c] ss:$16 sps:$4 sm:$0xff]  }
 0x115   :  { %1056 = vmatprep.subr.bf16.mxu1 %v3595_v36  ;;  %v4078_v36 = vld [vmem:[#allocation8 + $0x240] ss:$16 sps:$4 sm:$0xff]  }
 0x118   :  { %1057 = vmatpush1.bf16.msra.mxu1 %v3594_v39  ;;  %v4089_v39 = vld [vmem:[#allocation8 + $0x26c] ss:$16 sps:$4 sm:$0xff]  }
 0x119   :  { %1058 = vmatprep.subr.bf16.mxu1 %v3603_v40  ;;  %v4084_v40 = vld [vmem:[#allocation8 + $0x260] ss:$16 sps:$4 sm:$0xff]  }
 0x11c   :  { %1059 = vmatpush1.bf16.msra.mxu1 %v3602_v41  ;;  %v4087_v41 = vld [vmem:[#allocation8 + $0x268] ss:$16 sps:$4 sm:$0xff]  }
 0x11d   :  { %2807 = vmatprep.subr.bf16.mxu1 %v3975_v42  ;;  %v4092_v42 = vld [vmem:[#allocation8 + $0x284] ss:$16 sps:$4 sm:$0xff]  }
 0x11f   :  { %1061 = vmatmul.mubr.bf16.vlgmr.msra.gmra.mrb[8].mxu1 %v4706_v55  ;;  %v4011_v55 = vld [vmem:[#allocation8 + $0xcc] ss:$16 sps:$4 sm:$0xff]  }
 0x120   :  { %2808 = vmatpush1.bf16.msra.mxu1 %v3973_v43  ;;  %v4095_v43 = vld [vmem:[#allocation8 + $0x28c] ss:$16 sps:$4 sm:$0xff]  }
 0x121   :  { %2809 = vmatprep.subr.bf16.mxu1 %v3981_v44  ;;  %v4090_v44 = vld [vmem:[#allocation8 + $0x280] ss:$16 sps:$4 sm:$0xff]  }
 0x124   :  { %2810 = vmatpush1.bf16.msra.mxu1 %v3979_v45  ;;  %v4093_v45 = vld [vmem:[#allocation8 + $0x288] ss:$16 sps:$4 sm:$0xff]  }
 0x125   :  { %2811 = vmatprep.subr.bf16.mxu1 %v3987_v46 }
 0x128   :  { %2812 = vmatpush1.bf16.msra.mxu1 %v3985_v47  ;;  %v4098_v47 = vld [vmem:[#allocation8 + $0x2a4] ss:$16 sps:$4 sm:$0xff]  }
 0x129   :  { %2813 = vmatprep.subr.bf16.mxu1 %v3993_v48  ;;  %v4101_v48 = vld [vmem:[#allocation8 + $0x2ac] ss:$16 sps:$4 sm:$0xff]  }
 0x12c   :  { %2814 = vmatpush1.bf16.msra.mxu1 %v3991_v49 }
 0x12d   :  { %2815 = vmatprep.subr.bf16.mxu1 %v3999_v50 }
 0x130   :  { %2816 = vmatpush1.bf16.msra.mxu1 %v3997_v51 }
 0x131   :  { %2817 = vmatprep.subr.bf16.mxu1 %v4005_v52  ;;  %v4096_v52 = vld [vmem:[#allocation8 + $0x2a0] ss:$16 sps:$4 sm:$0xff]  }
 0x134   :  { %2818 = vmatpush1.bf16.msra.mxu1 %v4003_v53  ;;  %v4099_v53 = vld [vmem:[#allocation8 + $0x2a8] ss:$16 sps:$4 sm:$0xff]  }
 0x135   :  { %2819 = vmatprep.subr.bf16.mxu1 %v4011_v55  ;;  %v4104_v55 = vld [vmem:[#allocation8 + $0x2c4] ss:$16 sps:$4 sm:$0xff]  }
 0x138   :  { %2820 = vmatpush1.bf16.msra.mxu1 %v4009_v54  ;;  %v4107_v54 = vld [vmem:[#allocation8 + $0x2cc] ss:$16 sps:$4 sm:$0xff]  }
 0x139   :  { %2821 = vmatprep.subr.bf16.mxu1 %v4017_v56  ;;  %v4102_v56 = vld [vmem:[#allocation8 + $0x2c0] ss:$16 sps:$4 sm:$0xff]  }
 0x13c   :  { %2822 = vmatpush1.bf16.msra.mxu1 %v4015_v18  ;;  %v4105_v18 = vld [vmem:[#allocation8 + $0x2c8] ss:$16 sps:$4 sm:$0xff]  }
 0x13d   :  { %2823 = vmatprep.subr.bf16.mxu1 %v4023_v57  ;;  %v4110_v57 = vld [vmem:[#allocation8 + $0x2e4] ss:$16 sps:$4 sm:$0xff]  }
 0x140   :  { %2824 = vmatpush1.bf16.msra.mxu1 %v4021_v58  ;;  %v4113_v58 = vld [vmem:[#allocation8 + $0x2ec] ss:$16 sps:$4 sm:$0xff]  }
 0x141   :  { %2825 = vmatprep.subr.bf16.mxu1 %v4029_v59  ;;  %v4108_v59 = vld [vmem:[#allocation8 + $0x2e0] ss:$16 sps:$4 sm:$0xff]  }
 0x144   :  { %2826 = vmatpush1.bf16.msra.mxu1 %v4027_v60  ;;  %v4111_v60 = vld [vmem:[#allocation8 + $0x2e8] ss:$16 sps:$4 sm:$0xff]  }
 0x145   :  { %2827 = vmatprep.subr.bf16.mxu1 %v4035_v61  ;;  %v4116_v61 = vld [vmem:[#allocation8 + $0x304] ss:$16 sps:$4 sm:$0xff]  }
 0x148   :  { %2828 = vmatpush1.bf16.msra.mxu1 %v4033_v62  ;;  %v4119_v62 = vld [vmem:[#allocation8 + $0x30c] ss:$16 sps:$4 sm:$0xff]  }
 0x149   :  { %2829 = vmatprep.subr.bf16.mxu1 %v4041_v63  ;;  %v4114_v63 = vld [vmem:[#allocation8 + $0x300] ss:$16 sps:$4 sm:$0xff]  }
 0x14c   :  { %2830 = vmatpush1.bf16.msra.mxu1 %v4039_v0  ;;  %v4117_v0 = vld [vmem:[#allocation8 + $0x308] ss:$16 sps:$4 sm:$0xff]  }
 0x14d   :  { %2831 = vmatprep.subr.bf16.mxu1 %v4047_v1  ;;  %v4122_v1 = vld [vmem:[#allocation8 + $0x324] ss:$16 sps:$4 sm:$0xff]  }
 0x150   :  { %2832 = vmatpush1.bf16.msra.mxu1 %v4045_v2  ;;  %v4125_v2 = vld [vmem:[#allocation8 + $0x32c] ss:$16 sps:$4 sm:$0xff]  }
 0x151   :  { %2833 = vmatprep.subr.bf16.mxu1 %v4053_v3  ;;  %v4120_v3 = vld [vmem:[#allocation8 + $0x320] ss:$16 sps:$4 sm:$0xff]  }
 0x154   :  { %2834 = vmatpush1.bf16.msra.mxu1 %v4051_v4  ;;  %v4123_v4 = vld [vmem:[#allocation8 + $0x328] ss:$16 sps:$4 sm:$0xff]  }
 0x155   :  { %2835 = vmatprep.subr.bf16.mxu1 %v4059_v5  ;;  %v4128_v5 = vld [vmem:[#allocation8 + $0x344] ss:$16 sps:$4 sm:$0xff]  }
 0x158   :  { %2836 = vmatpush1.bf16.msra.mxu1 %v4057_v6  ;;  %v4131_v6 = vld [vmem:[#allocation8 + $0x34c] ss:$16 sps:$4 sm:$0xff]  }
 0x159   :  { %2837 = vmatprep.subr.bf16.mxu1 %v4065_v7  ;;  %v4126_v7 = vld [vmem:[#allocation8 + $0x340] ss:$16 sps:$4 sm:$0xff]  }
 0x15c   :  { %2838 = vmatpush1.bf16.msra.mxu1 %v4063_v8  ;;  %v4129_v8 = vld [vmem:[#allocation8 + $0x348] ss:$16 sps:$4 sm:$0xff]  }
 0x15d   :  { %2848 = vmatprep.subr.bf16.mxu1 %v4071_v9  ;;  %v4134_v9 = vld [vmem:[#allocation8 + $0x364] ss:$16 sps:$4 sm:$0xff]  }
 0x172   :  { %v939_v17 = vpop.f32.mrb[0].mxu1 }
 0x173   :  { %v940_v19 = vadd.f32 %v939_v17, %v228_v15  ;;  %v941_v20 = vpop.f32.mrb[1].mxu1  ;;  %v4132_v15 = vld [vmem:[#allocation8 + $0x360] ss:$16 sps:$4 sm:$0xff]   ;;  %v4140_v17 = vld [vmem:[#allocation8 + $0x384] ss:$16 sps:$4 sm:$0xff]  }
 0x174   :  { %v942_v21 = vadd.f32 %v941_v20, %v232_v16  ;;  %v943_v22 = vpop.f32.mrb[2].mxu1  ;;  %v4728_v46 = vpop.f32.mrb[0].mxu0  ;;  %v4135_v16 = vld [vmem:[#allocation8 + $0x368] ss:$16 sps:$4 sm:$0xff]   ;;  %v4138_v20 = vld [vmem:[#allocation8 + $0x380] ss:$16 sps:$4 sm:$0xff]  }
 0x175   :  { %v1069_v23 = vmax.f32 %v940_v19, 0.0  ;;  %v944_v24 = vpop.f32.mrb[3].mxu1  ;;  %v4730_v49 = vpop.f32.mrb[1].mxu0  ;;  %v4143_v19 = vld [vmem:[#allocation8 + $0x38c] ss:$16 sps:$4 sm:$0xff]  }
 0x176   :  { %v1070_v25 = vmax.f32 %v942_v21, 0.0  ;;  %v1025_v50 = vpop.f32.mrb[2].mxu0  ;;  %v4141_v21 = vld [vmem:[#allocation8 + $0x388] ss:$16 sps:$4 sm:$0xff]   ;;  %v4146_v22 = vld [vmem:[#allocation8 + $0x3a4] ss:$16 sps:$4 sm:$0xff]  }
 0x177   :  { %v1077_v29 = vpack.c.bf16 %v1069_v23, %v1069_v23  ;;  %v1026_v51 = vpop.f32.mrb[3].mxu0  ;;  %v4149_v23 = vld [vmem:[#allocation8 + $0x3ac] ss:$16 sps:$4 sm:$0xff]   ;;  %v247_v24 = vsub.s32 5, %v4714_v11  ;;  %v4164_v50 = vld [vmem:[#allocation8 + $0x404] ss:$16 sps:$4 sm:$0xff]  }
 0x178   :  { %v1078_v26 = vpack.c.bf16 %v1070_v25, %v1070_v25  ;;  %v235_v25 = vsub.s32 2, %v4714_v11  ;;  %v4167_v51 = vld [vmem:[#allocation8 + $0x40c] ss:$16 sps:$4 sm:$0xff]  }
 0x17a   :  { %2675 = vmatprep.mubr.bf16.mxu0 %v1078_v26  ;;  %2839 = vmatprep.mubr.bf16.mxu1 %v1078_v26  ;;  %v4144_v26 = vld [vmem:[#allocation8 + $0x3a0] ss:$16 sps:$4 sm:$0xff]  }
 0x17b   :  { %2676 = vmatmul.mubr.bf16.vlgmr.msra.gmra.mrb[4].mxu0 %v1077_v29  ;;  %2840 = vmatmul.mubr.bf16.vlgmr.msra.gmra.mrb[12].mxu1 %v1077_v29  ;;  %v4152_v29 = vld [vmem:[#allocation8 + $0x3c4] ss:$16 sps:$4 sm:$0xff]  }
 0x17c   :  { %2685 = vmatpush1.bf16.msra.mxu0 %v4066_v27  ;;  %2849 = vmatpush1.bf16.msra.mxu1 %v4069_v28  ;;  %v4147_v27 = vld [vmem:[#allocation8 + $0x3a8] ss:$16 sps:$4 sm:$0xff]   ;;  %v239_v28 = vsub.s32 3, %v4714_v11 }
 0x17d   :  { %2686 = vmatprep.subr.bf16.mxu0 %v4074_v30  ;;  %2850 = vmatprep.subr.bf16.mxu1 %v4077_v31  ;;  %v4155_v30 = vld [vmem:[#allocation8 + $0x3cc] ss:$16 sps:$4 sm:$0xff]   ;;  %v248_v31 = vrot.slane %v4719_v13, %v247_v24  ;;  %v4204_v24 = vld [vmem:[#allocation8 + $0x4e0] ss:$16 sps:$4 sm:$0xff]  }
 0x180   :  { %2687 = vmatpush1.bf16.msra.mxu0 %v4072_v32  ;;  %2851 = vmatpush1.bf16.msra.mxu1 %v4075_v33  ;;  %v236_v32 = vrot.slane %v4719_v13, %v235_v25  ;;  %v4150_v33 = vld [vmem:[#allocation8 + $0x3c0] ss:$16 sps:$4 sm:$0xff]  }
 0x181   :  { %2688 = vmatprep.subr.bf16.mxu0 %v4080_v34  ;;  %2852 = vmatprep.subr.bf16.mxu1 %v4083_v35  ;;  %v4153_v34 = vld [vmem:[#allocation8 + $0x3c8] ss:$16 sps:$4 sm:$0xff]   ;;  %v240_v35 = vrot.slane %v4719_v13, %v239_v28 }
 0x184   :  { %2689 = vmatpush1.bf16.msra.mxu0 %v4078_v36  ;;  %2853 = vmatpush1.bf16.msra.mxu1 %v4081_v37  ;;  %v4158_v36 = vld [vmem:[#allocation8 + $0x3e4] ss:$16 sps:$4 sm:$0xff]   ;;  %v4161_v37 = vld [vmem:[#allocation8 + $0x3ec] ss:$16 sps:$4 sm:$0xff]  }
 0x185   :  { %2690 = vmatprep.subr.bf16.mxu0 %v4086_v38  ;;  %2854 = vmatprep.subr.bf16.mxu1 %v4089_v39  ;;  %v1024_v39 = vadd.f32 %v4730_v49, %v248_v31  ;;  %v4162_v49 = vld [vmem:[#allocation8 + $0x400] ss:$16 sps:$4 sm:$0xff]   ;;  %v4213_v31 = vld [vmem:[#allocation8 + $0x508] ss:$16 sps:$4 sm:$0xff]  }
 0x188   :  { %2691 = vmatpush1.bf16.msra.mxu0 %v4084_v40  ;;  %2855 = vmatpush1.bf16.msra.mxu1 %v4087_v41 }
 0x189   :  { %2692 = vmatprep.subr.bf16.mxu0 %v4092_v42  ;;  %2856 = vmatprep.subr.bf16.mxu1 %v4095_v43 }
 0x18c   :  { %2693 = vmatpush1.bf16.msra.mxu0 %v4090_v44  ;;  %2857 = vmatpush1.bf16.msra.mxu1 %v4093_v45  ;;  %v4156_v44 = vld [vmem:[#allocation8 + $0x3e0] ss:$16 sps:$4 sm:$0xff]   ;;  %v4159_v45 = vld [vmem:[#allocation8 + $0x3e8] ss:$16 sps:$4 sm:$0xff]  }
 0x18d   :  { %2694 = vmatprep.subr.bf16.mxu0 %v4098_v47  ;;  %2858 = vmatprep.subr.bf16.mxu1 %v4101_v48 }
 0x190   :  { %2695 = vmatpush1.bf16.msra.mxu0 %v4096_v52  ;;  %2859 = vmatpush1.bf16.msra.mxu1 %v4099_v53  ;;  %v1074_v53 = vmax.f32 %v1024_v39, 0.0  ;;  %v4225_v39 = vld [vmem:[#allocation8 + $0x548] ss:$16 sps:$4 sm:$0xff]  }
 0x191   :  { %2696 = vmatprep.subr.bf16.mxu0 %v4104_v55  ;;  %2860 = vmatprep.subr.bf16.mxu1 %v4107_v54  ;;  %v4165_v54 = vld [vmem:[#allocation8 + $0x408] ss:$16 sps:$4 sm:$0xff]  }
 0x194   :  { %2697 = vmatpush1.bf16.msra.mxu0 %v4102_v56  ;;  %2861 = vmatpush1.bf16.msra.mxu1 %v4105_v18  ;;  %v4170_v18 = vld [vmem:[#allocation8 + $0x424] ss:$16 sps:$4 sm:$0xff]  }
 0x195   :  { %2698 = vmatprep.subr.bf16.mxu0 %v4110_v57  ;;  %2862 = vmatprep.subr.bf16.mxu1 %v4113_v58  ;;  %v4173_v57 = vld [vmem:[#allocation8 + $0x42c] ss:$16 sps:$4 sm:$0xff]   ;;  %v1082_v58 = vpack.c.bf16 %v1074_v53, %v1074_v53 }
 0x198   :  { %2699 = vmatpush1.bf16.msra.mxu0 %v4108_v59  ;;  %2863 = vmatpush1.bf16.msra.mxu1 %v4111_v60  ;;  %v4168_v59 = vld [vmem:[#allocation8 + $0x420] ss:$16 sps:$4 sm:$0xff]   ;;  %v4171_v60 = vld [vmem:[#allocation8 + $0x428] ss:$16 sps:$4 sm:$0xff]  }
 0x199   :  { %2700 = vmatprep.subr.bf16.mxu0 %v4116_v61  ;;  %2864 = vmatprep.subr.bf16.mxu1 %v4119_v62  ;;  %v4176_v61 = vld [vmem:[#allocation8 + $0x444] ss:$16 sps:$4 sm:$0xff]   ;;  %v4179_v62 = vld [vmem:[#allocation8 + $0x44c] ss:$16 sps:$4 sm:$0xff]  }
 0x19c   :  { %2701 = vmatpush1.bf16.msra.mxu0 %v4114_v63  ;;  %2865 = vmatpush1.bf16.msra.mxu1 %v4117_v0  ;;  %v4174_v63 = vld [vmem:[#allocation8 + $0x440] ss:$16 sps:$4 sm:$0xff]   ;;  %v4177_v0 = vld [vmem:[#allocation8 + $0x448] ss:$16 sps:$4 sm:$0xff]  }
 0x19d   :  { %2702 = vmatprep.subr.bf16.mxu0 %v4122_v1  ;;  %2866 = vmatprep.subr.bf16.mxu1 %v4125_v2  ;;  %v4182_v1 = vld [vmem:[#allocation8 + $0x464] ss:$16 sps:$4 sm:$0xff]   ;;  %v4185_v2 = vld [vmem:[#allocation8 + $0x46c] ss:$16 sps:$4 sm:$0xff]  }
 0x1a0   :  { %2703 = vmatpush1.bf16.msra.mxu0 %v4120_v3  ;;  %2867 = vmatpush1.bf16.msra.mxu1 %v4123_v4  ;;  %v4180_v3 = vld [vmem:[#allocation8 + $0x460] ss:$16 sps:$4 sm:$0xff]   ;;  %v4183_v4 = vld [vmem:[#allocation8 + $0x468] ss:$16 sps:$4 sm:$0xff]  }
 0x1a1   :  { %2704 = vmatprep.subr.bf16.mxu0 %v4128_v5  ;;  %2868 = vmatprep.subr.bf16.mxu1 %v4131_v6  ;;  %v4188_v5 = vld [vmem:[#allocation8 + $0x484] ss:$16 sps:$4 sm:$0xff]   ;;  %v4191_v6 = vld [vmem:[#allocation8 + $0x48c] ss:$16 sps:$4 sm:$0xff]  }
 0x1a4   :  { %2705 = vmatpush1.bf16.msra.mxu0 %v4126_v7  ;;  %2869 = vmatpush1.bf16.msra.mxu1 %v4129_v8  ;;  %v4186_v7 = vld [vmem:[#allocation8 + $0x480] ss:$16 sps:$4 sm:$0xff]   ;;  %v4189_v8 = vld [vmem:[#allocation8 + $0x488] ss:$16 sps:$4 sm:$0xff]  }
 0x1a5   :  { %2706 = vmatprep.subr.bf16.mxu0 %v4134_v9  ;;  %2870 = vmatprep.subr.bf16.mxu1 %v4137_v10  ;;  %v4194_v9 = vld [vmem:[#allocation8 + $0x4a4] ss:$16 sps:$4 sm:$0xff]   ;;  %v4197_v10 = vld [vmem:[#allocation8 + $0x4ac] ss:$16 sps:$4 sm:$0xff]  }
 0x1a8   :  { %2707 = vmatpush1.bf16.msra.mxu0 %v4132_v15  ;;  %2871 = vmatpush1.bf16.msra.mxu1 %v4135_v16  ;;  %v4192_v15 = vld [vmem:[#allocation8 + $0x4a0] ss:$16 sps:$4 sm:$0xff]   ;;  %v4195_v16 = vld [vmem:[#allocation8 + $0x4a8] ss:$16 sps:$4 sm:$0xff]  }
 0x1a9   :  { %2708 = vmatprep.subr.bf16.mxu0 %v4140_v17  ;;  %2872 = vmatprep.subr.bf16.mxu1 %v4143_v19  ;;  %v4200_v17 = vld [vmem:[#allocation8 + $0x4c4] ss:$16 sps:$4 sm:$0xff]   ;;  %v4203_v19 = vld [vmem:[#allocation8 + $0x4cc] ss:$16 sps:$4 sm:$0xff]  }
 0x1ac   :  { %2709 = vmatpush1.bf16.msra.mxu0 %v4138_v20  ;;  %2873 = vmatpush1.bf16.msra.mxu1 %v4141_v21  ;;  %v4198_v20 = vld [vmem:[#allocation8 + $0x4c0] ss:$16 sps:$4 sm:$0xff]   ;;  %v4201_v21 = vld [vmem:[#allocation8 + $0x4c8] ss:$16 sps:$4 sm:$0xff]  }
 0x1ad   :  { %2710 = vmatprep.subr.bf16.mxu0 %v4146_v22  ;;  %2874 = vmatprep.subr.bf16.mxu1 %v4149_v23  ;;  %v4206_v22 = vld [vmem:[#allocation8 + $0x4e4] ss:$16 sps:$4 sm:$0xff]   ;;  %v4209_v23 = vld [vmem:[#allocation8 + $0x4ec] ss:$16 sps:$4 sm:$0xff]  }
 0x1b0   :  { %2711 = vmatpush1.bf16.msra.mxu0 %v4144_v26  ;;  %2875 = vmatpush1.bf16.msra.mxu1 %v4147_v27  ;;  %v4207_v26 = vld [vmem:[#allocation8 + $0x4e8] ss:$16 sps:$4 sm:$0xff]   ;;  %v4212_v27 = vld [vmem:[#allocation8 + $0x504] ss:$16 sps:$4 sm:$0xff]  }
 0x1b1   :  { %2712 = vmatprep.subr.bf16.mxu0 %v4152_v29  ;;  %2876 = vmatprep.subr.bf16.mxu1 %v4155_v30  ;;  %v4215_v29 = vld [vmem:[#allocation8 + $0x50c] ss:$16 sps:$4 sm:$0xff]   ;;  %v4210_v30 = vld [vmem:[#allocation8 + $0x500] ss:$16 sps:$4 sm:$0xff]  }
 0x1b2   :  { %v980_v38 = vpop.f32.mrb[4].mxu1 }
 0x1b3   :  { %v981_v40 = vadd.f32 %v980_v38, %v236_v32  ;;  %v982_v41 = vpop.f32.mrb[5].mxu1  ;;  %v4218_v32 = vld [vmem:[#allocation8 + $0x524] ss:$16 sps:$4 sm:$0xff]   ;;  %v4222_v38 = vld [vmem:[#allocation8 + $0x540] ss:$16 sps:$4 sm:$0xff]  }
 0x1b4   :  { %v983_v42 = vadd.f32 %v982_v41, %v240_v35  ;;  %2713 = vmatpush1.bf16.msra.mxu0 %v4150_v33  ;;  %2877 = vmatpush1.bf16.msra.mxu1 %v4153_v34  ;;  %v984_v43 = vpop.f32.mrb[6].mxu1  ;;  %v4221_v33 = vld [vmem:[#allocation8 + $0x52c] ss:$16 sps:$4 sm:$0xff]   ;;  %v4216_v34 = vld [vmem:[#allocation8 + $0x520] ss:$16 sps:$4 sm:$0xff]  }
 0x1b5   :  { %v1071_v47 = vmax.f32 %v981_v40, 0.0  ;;  %v985_v48 = vpop.f32.mrb[7].mxu1  ;;  %2714 = vmatprep.subr.bf16.mxu0 %v4158_v36  ;;  %2878 = vmatprep.subr.bf16.mxu1 %v4161_v37  ;;  %v4219_v35 = vld [vmem:[#allocation8 + $0x528] ss:$16 sps:$4 sm:$0xff]   ;;  %v4224_v36 = vld [vmem:[#allocation8 + $0x544] ss:$16 sps:$4 sm:$0xff]  }
 0x1b6   :  { %v1072_v52 = vmax.f32 %v983_v42, 0.0  ;;  %v4227_v37 = vld [vmem:[#allocation8 + $0x54c] ss:$16 sps:$4 sm:$0xff]   ;;  %v4230_v40 = vld [vmem:[#allocation8 + $0x564] ss:$16 sps:$4 sm:$0xff]  }
 0x1b7   :  { %v1079_v56 = vpack.c.bf16 %v1071_v47, %v1071_v47  ;;  %v4233_v41 = vld [vmem:[#allocation8 + $0x56c] ss:$16 sps:$4 sm:$0xff]   ;;  %v4228_v42 = vld [vmem:[#allocation8 + $0x560] ss:$16 sps:$4 sm:$0xff]   ;;  %v4231_v43 = vld [vmem:[#allocation8 + $0x568] ss:$16 sps:$4 sm:$0xff]  }
 0x1b8   :  { %v1080_v55 = vpack.c.bf16 %v1072_v52, %v1072_v52  ;;  %2715 = vmatpush1.bf16.msra.mxu0 %v4156_v44  ;;  %2879 = vmatpush1.bf16.msra.mxu1 %v4159_v45  ;;  %v4236_v44 = vld [vmem:[#allocation8 + $0x584] ss:$16 sps:$4 sm:$0xff]   ;;  %v4239_v45 = vld [vmem:[#allocation8 + $0x58c] ss:$16 sps:$4 sm:$0xff]   ;;  %v243_v47 = vsub.s32 4, %v4714_v11 }
 0x1b9   :  { %2725 = vmatprep.subr.bf16.mxu0 %v4164_v50  ;;  %2889 = vmatprep.subr.bf16.mxu1 %v4167_v51  ;;  %v4234_v48 = vld [vmem:[#allocation8 + $0x580] ss:$16 sps:$4 sm:$0xff]   ;;  %v4237_v50 = vld [vmem:[#allocation8 + $0x588] ss:$16 sps:$4 sm:$0xff]   ;;  %v4242_v51 = vld [vmem:[#allocation8 + $0x5a4] ss:$16 sps:$4 sm:$0xff]  }
 0x1ba   :  { %2716 = vmatprep.mubr.bf16.mxu0 %v1080_v55  ;;  %2880 = vmatprep.mubr.bf16.mxu1 %v1080_v55  ;;  %v4245_v52 = vld [vmem:[#allocation8 + $0x5ac] ss:$16 sps:$4 sm:$0xff]   ;;  %v244_v53 = vrot.slane %v4719_v13, %v243_v47  ;;  %v4240_v55 = vld [vmem:[#allocation8 + $0x5a0] ss:$16 sps:$4 sm:$0xff]  }
 0x1bb   :  { %2717 = vmatmul.mubr.bf16.vlgmr.msra.gmra.mrb[4].mxu0 %v1079_v56  ;;  %2881 = vmatmul.mubr.bf16.vlgmr.msra.gmra.mrb[12].mxu1 %v1079_v56  ;;  %v4248_v56 = vld [vmem:[#allocation8 + $0x5c4] ss:$16 sps:$4 sm:$0xff]   ;;  %v4300_v47 = vld [vmem:[#allocation8 + $0x6e0] ss:$16 sps:$4 sm:$0xff]  }
 0x1bc   :  { %2726 = vmatpush1.bf16.msra.mxu0 %v4162_v49  ;;  %2890 = vmatpush1.bf16.msra.mxu1 %v4165_v54  ;;  %v4243_v49 = vld [vmem:[#allocation8 + $0x5a8] ss:$16 sps:$4 sm:$0xff]   ;;  %v255_v54 = vsub.s32 7, %v4714_v11 }
 0x1bd   :  { %2727 = vmatprep.subr.bf16.mxu0 %v4170_v18  ;;  %2891 = vmatprep.subr.bf16.mxu1 %v4173_v57  ;;  %v4251_v18 = vld [vmem:[#allocation8 + $0x5cc] ss:$16 sps:$4 sm:$0xff]   ;;  %v1022_v57 = vadd.f32 %v4728_v46, %v244_v53  ;;  %v4309_v53 = vld [vmem:[#allocation8 + $0x708] ss:$16 sps:$4 sm:$0xff]  }
 0x1be   :  { %2757 = vmatprep.mubr.bf16.mxu0 %v1082_v58  ;;  %2921 = vmatprep.mubr.bf16.mxu1 %v1082_v58  ;;  %v4246_v58 = vld [vmem:[#allocation8 + $0x5c0] ss:$16 sps:$4 sm:$0xff]  }
 0x1c0   :  { %2728 = vmatpush1.bf16.msra.mxu0 %v4168_v59  ;;  %2892 = vmatpush1.bf16.msra.mxu1 %v4171_v60  ;;  %v4249_v59 = vld [vmem:[#allocation8 + $0x5c8] ss:$16 sps:$4 sm:$0xff]   ;;  %v256_v60 = vrot.slane %v4719_v13, %v255_v54  ;;  %v4312_v54 = vld [vmem:[#allocation8 + $0x720] ss:$16 sps:$4 sm:$0xff]  }
 0x1c1   :  { %2729 = vmatprep.subr.bf16.mxu0 %v4176_v61  ;;  %2893 = vmatprep.subr.bf16.mxu1 %v4179_v62  ;;  %v4254_v61 = vld [vmem:[#allocation8 + $0x5e4] ss:$16 sps:$4 sm:$0xff]   ;;  %v4257_v62 = vld [vmem:[#allocation8 + $0x5ec] ss:$16 sps:$4 sm:$0xff]  }
 0x1c4   :  { %2730 = vmatpush1.bf16.msra.mxu0 %v4174_v63  ;;  %2894 = vmatpush1.bf16.msra.mxu1 %v4177_v0  ;;  %v1073_v0 = vmax.f32 %v1022_v57, 0.0  ;;  %v4323_v57 = vld [vmem:[#allocation8 + $0x74c] ss:$16 sps:$4 sm:$0xff]  }
 0x1c5   :  { %2731 = vmatprep.subr.bf16.mxu0 %v4182_v1  ;;  %2895 = vmatprep.subr.bf16.mxu1 %v4185_v2  ;;  %v4252_v2 = vld [vmem:[#allocation8 + $0x5e0] ss:$16 sps:$4 sm:$0xff]  }
 0x1c8   :  { %2732 = vmatpush1.bf16.msra.mxu0 %v4180_v3  ;;  %2896 = vmatpush1.bf16.msra.mxu1 %v4183_v4  ;;  %v4255_v3 = vld [vmem:[#allocation8 + $0x5e8] ss:$16 sps:$4 sm:$0xff]  }
 0x1c9   :  { %2733 = vmatprep.subr.bf16.mxu0 %v4188_v5  ;;  %2897 = vmatprep.subr.bf16.mxu1 %v4191_v6  ;;  %v4260_v5 = vld [vmem:[#allocation8 + $0x604] ss:$16 sps:$4 sm:$0xff]   ;;  %v4263_v6 = vld [vmem:[#allocation8 + $0x60c] ss:$16 sps:$4 sm:$0xff]  }
 0x1cc   :  { %2734 = vmatpush1.bf16.msra.mxu0 %v4186_v7  ;;  %2898 = vmatpush1.bf16.msra.mxu1 %v4189_v8 }
 0x1cd   :  { %2735 = vmatprep.subr.bf16.mxu0 %v4194_v9  ;;  %2899 = vmatprep.subr.bf16.mxu1 %v4197_v10  ;;  %v1081_v9 = vpack.c.bf16 %v1073_v0, %v1073_v0  ;;  %v4258_v10 = vld [vmem:[#allocation8 + $0x600] ss:$16 sps:$4 sm:$0xff]   ;;  %v4327_v0 = vld [vmem:[#allocation8 + $0x768] ss:$16 sps:$4 sm:$0xff]  }
 0x1d0   :  { %2736 = vmatpush1.bf16.msra.mxu0 %v4192_v15  ;;  %2900 = vmatpush1.bf16.msra.mxu1 %v4195_v16  ;;  %v4261_v15 = vld [vmem:[#allocation8 + $0x608] ss:$16 sps:$4 sm:$0xff]   ;;  %v4266_v16 = vld [vmem:[#allocation8 + $0x624] ss:$16 sps:$4 sm:$0xff]  }
 0x1d1   :  { %2737 = vmatprep.subr.bf16.mxu0 %v4200_v17  ;;  %2901 = vmatprep.subr.bf16.mxu1 %v4203_v19  ;;  %v4269_v17 = vld [vmem:[#allocation8 + $0x62c] ss:$16 sps:$4 sm:$0xff]  }
 0x1d4   :  { %2738 = vmatpush1.bf16.msra.mxu0 %v4198_v20  ;;  %2902 = vmatpush1.bf16.msra.mxu1 %v4201_v21  ;;  %v4264_v20 = vld [vmem:[#allocation8 + $0x620] ss:$16 sps:$4 sm:$0xff]   ;;  %v4267_v21 = vld [vmem:[#allocation8 + $0x628] ss:$16 sps:$4 sm:$0xff]  }
 0x1d5   :  { %2739 = vmatprep.subr.bf16.mxu0 %v4206_v22  ;;  %2903 = vmatprep.subr.bf16.mxu1 %v4209_v23  ;;  %v4272_v22 = vld [vmem:[#allocation8 + $0x644] ss:$16 sps:$4 sm:$0xff]   ;;  %v4275_v23 = vld [vmem:[#allocation8 + $0x64c] ss:$16 sps:$4 sm:$0xff]  }
 0x1d8   :  { %2740 = vmatpush1.bf16.msra.mxu0 %v4204_v24  ;;  %2904 = vmatpush1.bf16.msra.mxu1 %v4207_v26  ;;  %v4270_v24 = vld [vmem:[#allocation8 + $0x640] ss:$16 sps:$4 sm:$0xff]   ;;  %v4273_v26 = vld [vmem:[#allocation8 + $0x648] ss:$16 sps:$4 sm:$0xff]  }
 0x1d9   :  { %2741 = vmatprep.subr.bf16.mxu0 %v4212_v27  ;;  %2905 = vmatprep.subr.bf16.mxu1 %v4215_v29  ;;  %v4278_v27 = vld [vmem:[#allocation8 + $0x664] ss:$16 sps:$4 sm:$0xff]   ;;  %v4281_v29 = vld [vmem:[#allocation8 + $0x66c] ss:$16 sps:$4 sm:$0xff]  }
 0x1dc   :  { %2742 = vmatpush1.bf16.msra.mxu0 %v4210_v30  ;;  %2906 = vmatpush1.bf16.msra.mxu1 %v4213_v31  ;;  %v4276_v30 = vld [vmem:[#allocation8 + $0x660] ss:$16 sps:$4 sm:$0xff]   ;;  %v4279_v31 = vld [vmem:[#allocation8 + $0x668] ss:$16 sps:$4 sm:$0xff]  }
 0x1dd   :  { %2743 = vmatprep.subr.bf16.mxu0 %v4218_v32  ;;  %2907 = vmatprep.subr.bf16.mxu1 %v4221_v33  ;;  %v4284_v32 = vld [vmem:[#allocation8 + $0x684] ss:$16 sps:$4 sm:$0xff]   ;;  %v4287_v33 = vld [vmem:[#allocation8 + $0x68c] ss:$16 sps:$4 sm:$0xff]  }
 0x1e0   :  { %2744 = vmatpush1.bf16.msra.mxu0 %v4216_v34  ;;  %2908 = vmatpush1.bf16.msra.mxu1 %v4219_v35  ;;  %v4282_v34 = vld [vmem:[#allocation8 + $0x680] ss:$16 sps:$4 sm:$0xff]   ;;  %v4285_v35 = vld [vmem:[#allocation8 + $0x688] ss:$16 sps:$4 sm:$0xff]  }
 0x1e1   :  { %2745 = vmatprep.subr.bf16.mxu0 %v4224_v36  ;;  %2909 = vmatprep.subr.bf16.mxu1 %v4227_v37  ;;  %v4290_v36 = vld [vmem:[#allocation8 + $0x6a4] ss:$16 sps:$4 sm:$0xff]   ;;  %v4293_v37 = vld [vmem:[#allocation8 + $0x6ac] ss:$16 sps:$4 sm:$0xff]  }
 0x1e4   :  { %2746 = vmatpush1.bf16.msra.mxu0 %v4222_v38  ;;  %2910 = vmatpush1.bf16.msra.mxu1 %v4225_v39  ;;  %v4288_v38 = vld [vmem:[#allocation8 + $0x6a0] ss:$16 sps:$4 sm:$0xff]   ;;  %v4291_v39 = vld [vmem:[#allocation8 + $0x6a8] ss:$16 sps:$4 sm:$0xff]  }
 0x1e5   :  { %2747 = vmatprep.subr.bf16.mxu0 %v4230_v40  ;;  %2911 = vmatprep.subr.bf16.mxu1 %v4233_v41  ;;  %v4296_v40 = vld [vmem:[#allocation8 + $0x6c4] ss:$16 sps:$4 sm:$0xff]   ;;  %v4299_v41 = vld [vmem:[#allocation8 + $0x6cc] ss:$16 sps:$4 sm:$0xff]  }
 0x1e8   :  { %2748 = vmatpush1.bf16.msra.mxu0 %v4228_v42  ;;  %2912 = vmatpush1.bf16.msra.mxu1 %v4231_v43  ;;  %v4294_v42 = vld [vmem:[#allocation8 + $0x6c0] ss:$16 sps:$4 sm:$0xff]   ;;  %v4297_v43 = vld [vmem:[#allocation8 + $0x6c8] ss:$16 sps:$4 sm:$0xff]  }
 0x1e9   :  { %2749 = vmatprep.subr.bf16.mxu0 %v4236_v44  ;;  %2913 = vmatprep.subr.bf16.mxu1 %v4239_v45  ;;  %v4302_v44 = vld [vmem:[#allocation8 + $0x6e4] ss:$16 sps:$4 sm:$0xff]   ;;  %v4305_v45 = vld [vmem:[#allocation8 + $0x6ec] ss:$16 sps:$4 sm:$0xff]  }
 0x1ec   :  { %2750 = vmatpush1.bf16.msra.mxu0 %v4234_v48  ;;  %2914 = vmatpush1.bf16.msra.mxu1 %v4237_v50  ;;  %v4303_v48 = vld [vmem:[#allocation8 + $0x6e8] ss:$16 sps:$4 sm:$0xff]   ;;  %v4308_v50 = vld [vmem:[#allocation8 + $0x704] ss:$16 sps:$4 sm:$0xff]  }
 0x1ed   :  { %2751 = vmatprep.subr.bf16.mxu0 %v4242_v51  ;;  %2915 = vmatprep.subr.bf16.mxu1 %v4245_v52  ;;  %v4311_v51 = vld [vmem:[#allocation8 + $0x70c] ss:$16 sps:$4 sm:$0xff]   ;;  %v4306_v52 = vld [vmem:[#allocation8 + $0x700] ss:$16 sps:$4 sm:$0xff]  }
 0x1f0   :  { %2752 = vmatpush1.bf16.msra.mxu0 %v4240_v55  ;;  %2916 = vmatpush1.bf16.msra.mxu1 %v4243_v49  ;;  %v4314_v55 = vld [vmem:[#allocation8 + $0x724] ss:$16 sps:$4 sm:$0xff]   ;;  %v4317_v49 = vld [vmem:[#allocation8 + $0x72c] ss:$16 sps:$4 sm:$0xff]  }
 0x1f1   :  { %2753 = vmatprep.subr.bf16.mxu0 %v4248_v56  ;;  %2917 = vmatprep.subr.bf16.mxu1 %v4251_v18  ;;  %v4315_v56 = vld [vmem:[#allocation8 + $0x728] ss:$16 sps:$4 sm:$0xff]   ;;  %v4320_v18 = vld [vmem:[#allocation8 + $0x744] ss:$16 sps:$4 sm:$0xff]  }
 0x1f2   :  { %v4748_v63 = vpop.f32.mrb[8].mxu1 }
 0x1f3   :  { %v1064_v1 = vpop.f32.mrb[9].mxu1 }
 0x1f4   :  { %2754 = vmatpush1.bf16.msra.mxu0 %v4246_v58  ;;  %2918 = vmatpush1.bf16.msra.mxu1 %v4249_v59  ;;  %v1065_v4 = vadd.f32 %v1064_v1, %v256_v60  ;;  %v1066_v46 = vpop.f32.mrb[10].mxu1  ;;  %v4318_v58 = vld [vmem:[#allocation8 + $0x740] ss:$16 sps:$4 sm:$0xff]   ;;  %v4321_v59 = vld [vmem:[#allocation8 + $0x748] ss:$16 sps:$4 sm:$0xff]  }
 0x1f5   :  { %2755 = vmatprep.subr.bf16.mxu0 %v4254_v61  ;;  %2919 = vmatprep.subr.bf16.mxu1 %v4257_v62  ;;  %v1067_v7 = vpop.f32.mrb[11].mxu1  ;;  %v4326_v60 = vld [vmem:[#allocation8 + $0x764] ss:$16 sps:$4 sm:$0xff]   ;;  %v4329_v61 = vld [vmem:[#allocation8 + $0x76c] ss:$16 sps:$4 sm:$0xff]   ;;  %v251_v46 = vsub.s32 6, %v4714_v11 }
 0x1f6   :  { %v1076_v8 = vmax.f32 %v1065_v4, 0.0  ;;  %v4324_v62 = vld [vmem:[#allocation8 + $0x760] ss:$16 sps:$4 sm:$0xff]   ;;  %v4332_v1 = vld [vmem:[#allocation8 + $0x784] ss:$16 sps:$4 sm:$0xff]  }
 0x1f7   :  { %v4333_v4 = vld [vmem:[#allocation8 + $0x788] ss:$16 sps:$4 sm:$0xff]   ;;  %v4336_v7 = vld [vmem:[#allocation8 + $0x7a0] ss:$16 sps:$4 sm:$0xff]  }
 0x1f8   :  { %2756 = vmatpush1.bf16.msra.mxu0 %v4252_v2  ;;  %2920 = vmatpush1.bf16.msra.mxu1 %v4255_v3  ;;  %v1084_v19 = vpack.c.bf16 %v1076_v8, %v1076_v8  ;;  %v4335_v2 = vld [vmem:[#allocation8 + $0x78c] ss:$16 sps:$4 sm:$0xff]   ;;  %v4330_v3 = vld [vmem:[#allocation8 + $0x780] ss:$16 sps:$4 sm:$0xff]   ;;  %v4339_v8 = vld [vmem:[#allocation8 + $0x7a8] ss:$16 sps:$4 sm:$0xff]  }
 0x1f9   :  { %2766 = vmatprep.subr.bf16.mxu0 %v4260_v5  ;;  %2930 = vmatprep.subr.bf16.mxu1 %v4263_v6  ;;  %v4338_v5 = vld [vmem:[#allocation8 + $0x7a4] ss:$16 sps:$4 sm:$0xff]   ;;  %v4341_v6 = vld [vmem:[#allocation8 + $0x7ac] ss:$16 sps:$4 sm:$0xff]   ;;  %v3043_v11 = vld [vmem:[%s4794_s6] sm:$0x3] }
 0x1fb   :  { %2758 = vmatmul.mubr.bf16.vlgmr.msra.gmra.mrb[4].mxu0 %v1081_v9  ;;  %2922 = vmatmul.mubr.bf16.vlgmr.msra.gmra.mrb[12].mxu1 %v1081_v9  ;;  %v252_v9 = vrot.slane %v4719_v13, %v251_v46  ;;  %v4356_v13 = vld [vmem:[#allocation10 + $0x4] ss:$8 sps:$4 sm:$0xff]  }
 0x1fc   :  { %2767 = vmatpush1.bf16.msra.mxu0 %v4258_v10  ;;  %2931 = vmatpush1.bf16.msra.mxu1 %v4261_v15  ;;  %v4344_v10 = vld [vmem:[#allocation8 + $0x7c4] ss:$16 sps:$4 sm:$0xff]   ;;  %v4347_v15 = vld [vmem:[#allocation8 + $0x7cc] ss:$16 sps:$4 sm:$0xff]  }
 0x1fd   :  { %2768 = vmatprep.subr.bf16.mxu0 %v4266_v16  ;;  %2932 = vmatprep.subr.bf16.mxu1 %v4269_v17  ;;  %v4342_v16 = vld [vmem:[#allocation8 + $0x7c0] ss:$16 sps:$4 sm:$0xff]   ;;  %v4345_v17 = vld [vmem:[#allocation8 + $0x7c8] ss:$16 sps:$4 sm:$0xff]  }
 0x1fe   :  { %2798 = vmatprep.mubr.bf16.mxu0 %v1084_v19  ;;  %2962 = vmatprep.mubr.bf16.mxu1 %v1084_v19  ;;  %v1063_v19 = vadd.f32 %v4748_v63, %v252_v9  ;;  %v4357_v63 = vld [vmem:[#allocation10 + $0x10] ss:$8 sps:$4 sm:$0xff]  }
 0x200   :  { %2769 = vmatpush1.bf16.msra.mxu0 %v4264_v20  ;;  %2933 = vmatpush1.bf16.msra.mxu1 %v4267_v21  ;;  %v4350_v20 = vld [vmem:[#allocation8 + $0x7e4] ss:$16 sps:$4 sm:$0xff]   ;;  %v4353_v21 = vld [vmem:[#allocation8 + $0x7ec] ss:$16 sps:$4 sm:$0xff]  }
 0x201   :  { %2770 = vmatprep.subr.bf16.mxu0 %v4272_v22  ;;  %2934 = vmatprep.subr.bf16.mxu1 %v4275_v23  ;;  %v4348_v22 = vld [vmem:[#allocation8 + $0x7e0] ss:$16 sps:$4 sm:$0xff]   ;;  %v4351_v23 = vld [vmem:[#allocation8 + $0x7e8] ss:$16 sps:$4 sm:$0xff]  }
 0x204   :  { %2771 = vmatpush1.bf16.msra.mxu0 %v4270_v24  ;;  %2935 = vmatpush1.bf16.msra.mxu1 %v4273_v26  ;;  %v1075_v24 = vmax.f32 %v1063_v19, 0.0  ;;  %v4354_v26 = vld [vmem:[#allocation10] ss:$8 sps:$4 sm:$0xff]  }
 0x205   :  { %2772 = vmatprep.subr.bf16.mxu0 %v4278_v27  ;;  %2936 = vmatprep.subr.bf16.mxu1 %v4281_v29  ;;  %v4359_v29 = vld [vmem:[#allocation10 + $0x14] ss:$8 sps:$4 sm:$0xff]   ;;  %v4402_v19 = vld [vmem:[#allocation10 + $0x100] ss:$8 sps:$4 sm:$0xff]  }
 0x206   :  { %v1083_v27 = vpack.c.bf16 %v1075_v24, %v1075_v24  ;;  %v4408_v24 = vld [vmem:[#allocation10 + $0x120] ss:$8 sps:$4 sm:$0xff]  }
 0x208   :  { %2773 = vmatpush1.bf16.msra.mxu0 %v4276_v30  ;;  %2937 = vmatpush1.bf16.msra.mxu1 %v4279_v31  ;;  %v4362_v30 = vld [vmem:[#allocation10 + $0x24] ss:$8 sps:$4 sm:$0xff]   ;;  %v4360_v31 = vld [vmem:[#allocation10 + $0x20] ss:$8 sps:$4 sm:$0xff]  }
 0x209   :  { %2774 = vmatprep.subr.bf16.mxu0 %v4284_v32  ;;  %2938 = vmatprep.subr.bf16.mxu1 %v4287_v33  ;;  %v4365_v32 = vld [vmem:[#allocation10 + $0x34] ss:$8 sps:$4 sm:$0xff]   ;;  %v4363_v33 = vld [vmem:[#allocation10 + $0x30] ss:$8 sps:$4 sm:$0xff]  }
 0x20c   :  { %2775 = vmatpush1.bf16.msra.mxu0 %v4282_v34  ;;  %2939 = vmatpush1.bf16.msra.mxu1 %v4285_v35  ;;  %v4368_v34 = vld [vmem:[#allocation10 + $0x44] ss:$8 sps:$4 sm:$0xff]   ;;  %v4366_v35 = vld [vmem:[#allocation10 + $0x40] ss:$8 sps:$4 sm:$0xff]  }
 0x20d   :  { %2776 = vmatprep.subr.bf16.mxu0 %v4290_v36  ;;  %2940 = vmatprep.subr.bf16.mxu1 %v4293_v37  ;;  %v4371_v36 = vld [vmem:[#allocation10 + $0x54] ss:$8 sps:$4 sm:$0xff]   ;;  %v4369_v37 = vld [vmem:[#allocation10 + $0x50] ss:$8 sps:$4 sm:$0xff]  }
 0x210   :  { %2777 = vmatpush1.bf16.msra.mxu0 %v4288_v38  ;;  %2941 = vmatpush1.bf16.msra.mxu1 %v4291_v39  ;;  %v4374_v38 = vld [vmem:[#allocation10 + $0x64] ss:$8 sps:$4 sm:$0xff]   ;;  %v4372_v39 = vld [vmem:[#allocation10 + $0x60] ss:$8 sps:$4 sm:$0xff]  }
 0x211   :  { %2778 = vmatprep.subr.bf16.mxu0 %v4296_v40  ;;  %2942 = vmatprep.subr.bf16.mxu1 %v4299_v41  ;;  %v4377_v40 = vld [vmem:[#allocation10 + $0x74] ss:$8 sps:$4 sm:$0xff]   ;;  %v4375_v41 = vld [vmem:[#allocation10 + $0x70] ss:$8 sps:$4 sm:$0xff]  }
 0x214   :  { %2779 = vmatpush1.bf16.msra.mxu0 %v4294_v42  ;;  %2943 = vmatpush1.bf16.msra.mxu1 %v4297_v43  ;;  %v4380_v42 = vld [vmem:[#allocation10 + $0x84] ss:$8 sps:$4 sm:$0xff]   ;;  %v4378_v43 = vld [vmem:[#allocation10 + $0x80] ss:$8 sps:$4 sm:$0xff]  }
 0x215   :  { %2780 = vmatprep.subr.bf16.mxu0 %v4302_v44  ;;  %2944 = vmatprep.subr.bf16.mxu1 %v4305_v45  ;;  %v4383_v44 = vld [vmem:[#allocation10 + $0x94] ss:$8 sps:$4 sm:$0xff]   ;;  %v4381_v45 = vld [vmem:[#allocation10 + $0x90] ss:$8 sps:$4 sm:$0xff]  }
 0x218   :  { %2781 = vmatpush1.bf16.msra.mxu0 %v4300_v47  ;;  %2945 = vmatpush1.bf16.msra.mxu1 %v4303_v48  ;;  %v4386_v47 = vld [vmem:[#allocation10 + $0xa4] ss:$8 sps:$4 sm:$0xff]   ;;  %v4384_v48 = vld [vmem:[#allocation10 + $0xa0] ss:$8 sps:$4 sm:$0xff]  }
 0x219   :  { %2782 = vmatprep.subr.bf16.mxu0 %v4308_v50  ;;  %2946 = vmatprep.subr.bf16.mxu1 %v4311_v51  ;;  %v4389_v50 = vld [vmem:[#allocation10 + $0xb4] ss:$8 sps:$4 sm:$0xff]   ;;  %v4387_v51 = vld [vmem:[#allocation10 + $0xb0] ss:$8 sps:$4 sm:$0xff]  }
 0x21c   :  { %2783 = vmatpush1.bf16.msra.mxu0 %v4306_v52  ;;  %2947 = vmatpush1.bf16.msra.mxu1 %v4309_v53  ;;  %v4392_v52 = vld [vmem:[#allocation10 + $0xc4] ss:$8 sps:$4 sm:$0xff]   ;;  %v4390_v53 = vld [vmem:[#allocation10 + $0xc0] ss:$8 sps:$4 sm:$0xff]  }
 0x21d   :  { %2784 = vmatprep.subr.bf16.mxu0 %v4314_v55  ;;  %2948 = vmatprep.subr.bf16.mxu1 %v4317_v49  ;;  %v4395_v55 = vld [vmem:[#allocation10 + $0xd4] ss:$8 sps:$4 sm:$0xff]   ;;  %v4393_v49 = vld [vmem:[#allocation10 + $0xd0] ss:$8 sps:$4 sm:$0xff]  }
 0x220   :  { %2785 = vmatpush1.bf16.msra.mxu0 %v4312_v54  ;;  %2949 = vmatpush1.bf16.msra.mxu1 %v4315_v56  ;;  %v4398_v54 = vld [vmem:[#allocation10 + $0xe4] ss:$8 sps:$4 sm:$0xff]   ;;  %v4396_v56 = vld [vmem:[#allocation10 + $0xe0] ss:$8 sps:$4 sm:$0xff]  }
 0x221   :  { %2786 = vmatprep.subr.bf16.mxu0 %v4320_v18  ;;  %2950 = vmatprep.subr.bf16.mxu1 %v4323_v57  ;;  %v4401_v18 = vld [vmem:[#allocation10 + $0xf4] ss:$8 sps:$4 sm:$0xff]   ;;  %v4399_v57 = vld [vmem:[#allocation10 + $0xf0] ss:$8 sps:$4 sm:$0xff]  }
 0x224   :  { %2787 = vmatpush1.bf16.msra.mxu0 %v4318_v58  ;;  %2951 = vmatpush1.bf16.msra.mxu1 %v4321_v59  ;;  %v4404_v58 = vld [vmem:[#allocation10 + $0x104] ss:$8 sps:$4 sm:$0xff]   ;;  %v4756_v59 = vld [vmem:[%s4792_s4] sm:$0xf] }
 0x225   :  { %2788 = vmatprep.subr.bf16.mxu0 %v4326_v60  ;;  %2952 = vmatprep.subr.bf16.mxu1 %v4329_v61  ;;  %v1346_v60 = vrot.slane %v4756_v59, %v4717_v12  ;;  %v1350_v61 = vrot.slane %v4756_v59, %v4722_v14 }
 0x228   :  { %2789 = vmatpush1.bf16.msra.mxu0 %v4324_v62  ;;  %2953 = vmatpush1.bf16.msra.mxu1 %v4327_v0  ;;  %v1358_v62 = vrot.slane %v4756_v59, %v239_v28 }
 0x229   :  { %2790 = vmatprep.subr.bf16.mxu0 %v4332_v1  ;;  %2954 = vmatprep.subr.bf16.mxu1 %v4335_v2 }
 0x22c   :  { %2791 = vmatpush1.bf16.msra.mxu0 %v4330_v3  ;;  %2955 = vmatpush1.bf16.msra.mxu1 %v4333_v4 }
 0x22d   :  { %2792 = vmatprep.subr.bf16.mxu0 %v4338_v5  ;;  %2956 = vmatprep.subr.bf16.mxu1 %v4341_v6 }
 0x230   :  { %2793 = vmatpush1.bf16.msra.mxu0 %v4336_v7  ;;  %2957 = vmatpush1.bf16.msra.mxu1 %v4339_v8 }
 0x231   :  { %2794 = vmatprep.subr.bf16.mxu0 %v4344_v10  ;;  %2958 = vmatprep.subr.bf16.mxu1 %v4347_v15 }
 0x234   :  { %2795 = vmatpush1.bf16.msra.mxu0 %v4342_v16  ;;  %2959 = vmatpush1.bf16.msra.mxu1 %v4345_v17 }
 0x235   :  { %2796 = vmatprep.subr.bf16.mxu0 %v4350_v20  ;;  %2960 = vmatprep.subr.bf16.mxu1 %v4353_v21  ;;  %v4407_v21 = vld [vmem:[#allocation10 + $0x114] ss:$8 sps:$4 sm:$0xff]  }
 0x238   :  { %2797 = vmatpush1.bf16.msra.mxu0 %v4348_v22  ;;  %2961 = vmatpush1.bf16.msra.mxu1 %v4351_v23  ;;  %v4405_v22 = vld [vmem:[#allocation10 + $0x110] ss:$8 sps:$4 sm:$0xff]   ;;  %v4410_v23 = vld [vmem:[#allocation10 + $0x124] ss:$8 sps:$4 sm:$0xff]  }
 0x239   :  { %3375 = vmatprep.subr.bf16.mxu0 %v4356_v13  ;;  %v4413_v13 = vld [vmem:[#allocation10 + $0x134] ss:$8 sps:$4 sm:$0xff]  }
 0x23b   :  { %2799 = vmatmul.mubr.bf16.vlgmr.msra.gmra.mrb[4].mxu0 %v1083_v27  ;;  %2963 = vmatmul.mubr.bf16.vlgmr.msra.gmra.mrb[12].mxu1 %v1083_v27  ;;  %v4416_v27 = vld [vmem:[#allocation10 + $0x144] ss:$8 sps:$4 sm:$0xff]  }
 0x23c   :  { %3376 = vmatpush1.bf16.msra.mxu0 %v4354_v26  ;;  %v4411_v26 = vld [vmem:[#allocation10 + $0x130] ss:$8 sps:$4 sm:$0xff]  }
 0x23d   :  { %3377 = vmatprep.subr.bf16.mxu0 %v4359_v29  ;;  %v4414_v29 = vld [vmem:[#allocation10 + $0x140] ss:$8 sps:$4 sm:$0xff]  }
 0x240   :  { %3378 = vmatpush1.bf16.msra.mxu0 %v4357_v63  ;;  %v4419_v63 = vld [vmem:[#allocation10 + $0x154] ss:$8 sps:$4 sm:$0xff]  }
 0x241   :  { %3379 = vmatprep.subr.bf16.mxu0 %v4362_v30  ;;  %v4417_v30 = vld [vmem:[#allocation10 + $0x150] ss:$8 sps:$4 sm:$0xff]  }
 0x244   :  { %3380 = vmatpush1.bf16.msra.mxu0 %v4360_v31  ;;  %v4422_v31 = vld [vmem:[#allocation10 + $0x164] ss:$8 sps:$4 sm:$0xff]  }
 0x245   :  { %3381 = vmatprep.subr.bf16.mxu0 %v4365_v32  ;;  %v4420_v32 = vld [vmem:[#allocation10 + $0x160] ss:$8 sps:$4 sm:$0xff]  }
 0x248   :  { %3382 = vmatpush1.bf16.msra.mxu0 %v4363_v33  ;;  %v4425_v33 = vld [vmem:[#allocation10 + $0x174] ss:$8 sps:$4 sm:$0xff]  }
 0x249   :  { %3383 = vmatprep.subr.bf16.mxu0 %v4368_v34  ;;  %v4423_v34 = vld [vmem:[#allocation10 + $0x170] ss:$8 sps:$4 sm:$0xff]  }
 0x24c   :  { %3384 = vmatpush1.bf16.msra.mxu0 %v4366_v35  ;;  %v4428_v35 = vld [vmem:[#allocation10 + $0x184] ss:$8 sps:$4 sm:$0xff]  }
 0x24d   :  { %3385 = vmatprep.subr.bf16.mxu0 %v4371_v36  ;;  %v4426_v36 = vld [vmem:[#allocation10 + $0x180] ss:$8 sps:$4 sm:$0xff]  }
 0x250   :  { %3386 = vmatpush1.bf16.msra.mxu0 %v4369_v37  ;;  %v4431_v37 = vld [vmem:[#allocation10 + $0x194] ss:$8 sps:$4 sm:$0xff]  }
 0x251   :  { %3387 = vmatprep.subr.bf16.mxu0 %v4374_v38  ;;  %v4429_v38 = vld [vmem:[#allocation10 + $0x190] ss:$8 sps:$4 sm:$0xff]  }
 0x254   :  { %3388 = vmatpush1.bf16.msra.mxu0 %v4372_v39  ;;  %v4434_v39 = vld [vmem:[#allocation10 + $0x1a4] ss:$8 sps:$4 sm:$0xff]  }
 0x255   :  { %3389 = vmatprep.subr.bf16.mxu0 %v4377_v40  ;;  %v4432_v40 = vld [vmem:[#allocation10 + $0x1a0] ss:$8 sps:$4 sm:$0xff]  }
 0x258   :  { %3390 = vmatpush1.bf16.msra.mxu0 %v4375_v41  ;;  %v4437_v41 = vld [vmem:[#allocation10 + $0x1b4] ss:$8 sps:$4 sm:$0xff]  }
 0x259   :  { %3391 = vmatprep.subr.bf16.mxu0 %v4380_v42  ;;  %v4435_v42 = vld [vmem:[#allocation10 + $0x1b0] ss:$8 sps:$4 sm:$0xff]  }
 0x25c   :  { %3392 = vmatpush1.bf16.msra.mxu0 %v4378_v43  ;;  %v4440_v43 = vld [vmem:[#allocation10 + $0x1c4] ss:$8 sps:$4 sm:$0xff]  }
 0x25d   :  { %3393 = vmatprep.subr.bf16.mxu0 %v4383_v44  ;;  %v4438_v44 = vld [vmem:[#allocation10 + $0x1c0] ss:$8 sps:$4 sm:$0xff]  }
 0x260   :  { %3394 = vmatpush1.bf16.msra.mxu0 %v4381_v45  ;;  %v4443_v45 = vld [vmem:[#allocation10 + $0x1d4] ss:$8 sps:$4 sm:$0xff]  }
 0x261   :  { %3395 = vmatprep.subr.bf16.mxu0 %v4386_v47  ;;  %v4441_v47 = vld [vmem:[#allocation10 + $0x1d0] ss:$8 sps:$4 sm:$0xff]  }
 0x264   :  { %3396 = vmatpush1.bf16.msra.mxu0 %v4384_v48  ;;  %v1354_v48 = vrot.slane %v4756_v59, %v235_v25  ;;  %v3048_v25 = vrot.slane %v3043_v11, %v4717_v12 }
 0x265   :  { %3397 = vmatprep.subr.bf16.mxu0 %v4389_v50  ;;  %v4446_v50 = vld [vmem:[#allocation10 + $0x1e4] ss:$8 sps:$4 sm:$0xff]  }
 0x268   :  { %3398 = vmatpush1.bf16.msra.mxu0 %v4387_v51  ;;  %v4444_v51 = vld [vmem:[#allocation10 + $0x1e0] ss:$8 sps:$4 sm:$0xff]  }
 0x269   :  { %3399 = vmatprep.subr.bf16.mxu0 %v4392_v52 }
 0x26c   :  { %3400 = vmatpush1.bf16.msra.mxu0 %v4390_v53  ;;  %v4449_v53 = vld [vmem:[#allocation10 + $0x1f4] ss:$8 sps:$4 sm:$0xff]  }
 0x26d   :  { %3401 = vmatprep.subr.bf16.mxu0 %v4395_v55  ;;  %v4447_v55 = vld [vmem:[#allocation10 + $0x1f0] ss:$8 sps:$4 sm:$0xff]  }
 0x270   :  { %3402 = vmatpush1.bf16.msra.mxu0 %v4393_v49 }
 0x271   :  { %3403 = vmatprep.subr.bf16.mxu0 %v4398_v54 }
 0x274   :  { %3404 = vmatpush1.bf16.msra.mxu0 %v4396_v56  ;;  %v3052_v56 = vrot.slane %v3043_v11, %v4722_v14 }
 0x275   :  { %3405 = vmatprep.subr.bf16.mxu0 %v4401_v18 }
 0x278   :  { %3406 = vmatpush1.bf16.msra.mxu0 %v4399_v57 }
 0x279   :  { %3416 = vmatprep.subr.bf16.mxu0 %v4404_v58 }
 0x30e   :  { %v2800_v0 = vpop.f32.mrb[4].mxu0  ;;  %v4765_v1 = vpop.f32.mrb[12].mxu1 }
 0x30f   :  { %v3924_v2 = vadd.f32 %v2800_v0, %v1346_v60  ;;  %v2802_v3 = vpop.f32.mrb[5].mxu0  ;;  %v2966_v4 = vpop.f32.mrb[13].mxu1  ;;  %v3926_v52 = vadd.f32 %v4765_v1, %v1354_v48 }
 0x310   :  { %v3925_v46 = vadd.f32 %v2802_v3, %v1350_v61  ;;  %v3927_v5 = vadd.f32 %v2966_v4, %v1358_v62  ;;  %v2804_v6 = vpop.f32.mrb[6].mxu0  ;;  %v2968_v7 = vpop.f32.mrb[14].mxu1 }
 0x311   :  { %v2971_v8 = vmax.f32 %v3924_v2, 0.0  ;;  %v2805_v9 = vpop.f32.mrb[7].mxu0  ;;  %v2969_v10 = vpop.f32.mrb[15].mxu1  ;;  %v2973_v49 = vmax.f32 %v3926_v52, 0.0 }
 0x312   :  { %v2972_v15 = vmax.f32 %v3925_v46, 0.0  ;;  %v2974_v16 = vmax.f32 %v3927_v5, 0.0 }
 0x313   :  { %v2975_v20 = vpack.c.bf16 %v2971_v8, %v2971_v8  ;;  %v2977_v54 = vpack.c.bf16 %v2973_v49, %v2973_v49 }
 0x314   :  { %v2976_v17 = vpack.c.bf16 %v2972_v15, %v2972_v15  ;;  %v2978_v28 = vpack.c.bf16 %v2974_v16, %v2974_v16 }
 0x316   :  { %3407 = vmatprep.mubr.bf16.mxu0 %v2976_v17 }
 0x317   :  { %3408 = vmatmul.mubr.bf16.vlgmr.msra.gmra.mrb[8].mxu0 %v2975_v20 }
 0x318   :  { %3417 = vmatpush1.bf16.msra.mxu0 %v4402_v19  ;;  %3448 = vmatprep.mubr.bf16.mxu0 %v2978_v28 }
 0x319   :  { %3418 = vmatprep.subr.bf16.mxu0 %v4407_v21 }
 0x31c   :  { %3419 = vmatpush1.bf16.msra.mxu0 %v4405_v22 }
 0x31d   :  { %3420 = vmatprep.subr.bf16.mxu0 %v4410_v23 }
 0x320   :  { %3421 = vmatpush1.bf16.msra.mxu0 %v4408_v24 }
 0x321   :  { %3422 = vmatprep.subr.bf16.mxu0 %v4413_v13 }
 0x324   :  { %3423 = vmatpush1.bf16.msra.mxu0 %v4411_v26 }
 0x325   :  { %3424 = vmatprep.subr.bf16.mxu0 %v4416_v27 }
 0x328   :  { %3425 = vmatpush1.bf16.msra.mxu0 %v4414_v29 }
 0x329   :  { %3426 = vmatprep.subr.bf16.mxu0 %v4419_v63 }
 0x32c   :  { %3427 = vmatpush1.bf16.msra.mxu0 %v4417_v30 }
 0x32d   :  { %3428 = vmatprep.subr.bf16.mxu0 %v4422_v31 }
 0x330   :  { %3429 = vmatpush1.bf16.msra.mxu0 %v4420_v32 }
 0x331   :  { %3430 = vmatprep.subr.bf16.mxu0 %v4425_v33 }
 0x334   :  { %3431 = vmatpush1.bf16.msra.mxu0 %v4423_v34 }
 0x335   :  { %3432 = vmatprep.subr.bf16.mxu0 %v4428_v35 }
 0x338   :  { %3433 = vmatpush1.bf16.msra.mxu0 %v4426_v36 }
 0x339   :  { %3434 = vmatprep.subr.bf16.mxu0 %v4431_v37 }
 0x33c   :  { %3435 = vmatpush1.bf16.msra.mxu0 %v4429_v38 }
 0x33d   :  { %3436 = vmatprep.subr.bf16.mxu0 %v4434_v39 }
 0x340   :  { %3437 = vmatpush1.bf16.msra.mxu0 %v4432_v40 }
 0x341   :  { %3438 = vmatprep.subr.bf16.mxu0 %v4437_v41 }
 0x344   :  { %3439 = vmatpush1.bf16.msra.mxu0 %v4435_v42 }
 0x345   :  { %3440 = vmatprep.subr.bf16.mxu0 %v4440_v43 }
 0x348   :  { %3441 = vmatpush1.bf16.msra.mxu0 %v4438_v44 }
 0x349   :  { %3442 = vmatprep.subr.bf16.mxu0 %v4443_v45 }
 0x34c   :  { %3443 = vmatpush1.bf16.msra.mxu0 %v4441_v47 }
 0x34d   :  { %3444 = vmatprep.subr.bf16.mxu0 %v4446_v50 }
 0x350   :  { %3445 = vmatpush1.bf16.msra.mxu0 %v4444_v51 }
 0x351   :  { %3446 = vmatprep.subr.bf16.mxu0 %v4449_v53 }
 0x354   :  { %3447 = vmatpush1.bf16.msra.mxu0 %v4447_v55 }
 0x357   :  { %3449 = vmatmul.mubr.bf16.vlgmr.msra.gmra.mrb[8].mxu0 %v2977_v54 }
 0x42a   :  { %v3450_v18 = vpop.f32.mrb[8].mxu0 }
 0x42b   :  { %v3928_v57 = vadd.f32 %v3450_v18, %v3048_v25  ;;  %v3452_v58 = vpop.f32.mrb[9].mxu0 }
 0x42c   :  { %v3929_v59 = vadd.f32 %v3452_v58, %v3052_v56  ;;  %v3454_v60 = vpop.f32.mrb[10].mxu0 }
 0x42d   :  { %3457 = vst [vmem:[#allocation11] sm:$0xff] %v3928_v57  ;;  %v3455_v61 = vpop.f32.mrb[11].mxu0 }
 0x42e   :  { %3458 = vst [vmem:[#allocation11 + $0x8] sm:$0xff] %v3929_v59 }
 0x42f   :  { %4571 = shalt.err (!%p4568_p2)
}
 0x430   :  { %s4572_s21 = scalar_lea.hbm %s4795_s7, 256 }
 0x431   :  { %p4573_p3 = scmp.ne.s32.totalorder %s4795_s7, %s4572_s21  ;;  %p4576_p4 = scmp.lt.u32.totalorder %s4572_s21, %s4795_s7 }
 0x433   :  { %p4578_p5 = pnand %p4576_p4, %p4573_p3 }
 0x435   :  { %4581 = shalt.err (!%p4578_p5)
}
 0x436   :  { %3468 = dma.vmem_to_hbm [thread:$0]  %s3466_s18, 256, %s4795_s7, [#allocation4]  }
 0x437   :  { %4588 = dma.done.wait [#allocation4], 256  }
 0x438   :  { %4589 = vsyncadd [#allocation4], 4294967040 }
 0x439   :  { %3472 = vsyncpa [#allocation3], 1 }
 0x43a   :  { %3473 = vsyncpa [#allocation6], 1 }
 0x43b   :  { %3474 = vsyncpa [#allocation9], 1 }
 0x43c   :  { %3475 = vsyncpa [#allocation4], 1 }

</bundles_post_ra>
